<compile_context>
chip_gen: v6e
topology: v6e:2x2x1
jax: 0.10.0
libtpu: 0.0.40
codegen_flags: <defaults>
</compile_context>

<pallas_src>
import jax
import jax.numpy as jnp
from jax.experimental import pallas as pl
from jax.experimental.pallas import tpu as pltpu

HIDDEN = 512
OUT_PAD = 128          # lane-dense padded output width (>= action_dim, multiple of 128)
BN_EPS = 1e-5
LEAKY_SLOPE = 0.2
N_STREAMED = 3         # hidden layers 2..4 streamed over the grid


def _bn_leaky(h, gamma, beta):
    """Training-mode BatchNorm1d (batch stats, biased var) + LeakyReLU(0.2), all in f32."""
    inv_b = 1.0 / h.shape[0]                                   # static python float
    s = jnp.sum(h, axis=0, keepdims=True)
    ss = jnp.sum(h * h, axis=0, keepdims=True)
    mean = s * inv_b
    var = jnp.maximum(ss * inv_b - mean * mean, 0.0)           # clamp: one-pass var can go <0
    scale = jax.lax.rsqrt(var + BN_EPS) * gamma
    h = (h - mean) * scale + beta
    return jnp.maximum(h, LEAKY_SLOPE * h)                     # LeakyReLU, slope < 1


def acnet_kernel(x_ref, w1_ref, wstack_ref, pvec_ref, w5_hbm,   # inputs
                 o_ref,                                         # output
                 h_ref, w5_vmem, w5_sem):                       # scratch
    # pvec layout (f32, (9, 512)): rows 0..3 gamma1..4, rows 4..7 beta1..4,
    # row 8 = b5 in the first OUT_PAD lanes (zero-padded).
    k = pl.program_id(0)
    last = pl.num_programs(0) - 1

    @pl.when(k == 0)
    def _():
        # Kick off the final-layer weight fetch; it completes behind layers 1..4.
        pltpu.make_async_copy(w5_hbm, w5_vmem, w5_sem).start()
        # layer 1: Linear(state_size, 512) [bias cancelled by BN] -> BN -> LeakyReLU
        h1 = jnp.dot(x_ref[...].astype(jnp.bfloat16), w1_ref[...],
                     preferred_element_type=jnp.float32)
        h_ref[...] = _bn_leaky(h1, pvec_ref[0:1, :], pvec_ref[4:5, :])

    # hidden layer k+2 (weights streamed: BlockSpec double-buffers wstack[k+1] behind this)
    gamma = pvec_ref[pl.ds(1 + k, 1), :]
    beta = pvec_ref[pl.ds(5 + k, 1), :]
    h = jnp.dot(h_ref[...].astype(jnp.bfloat16), wstack_ref[...],
                preferred_element_type=jnp.float32)
    h_ref[...] = _bn_leaky(h, gamma, beta)

    @pl.when(k == last)
    def _():
        # layer 5: Linear(512, action_dim) + b5 -> tanh, lane-dense (B, 128) store.
        pltpu.make_async_copy(w5_hbm, w5_vmem, w5_sem).wait()
        a = jnp.dot(h_ref[...].astype(jnp.bfloat16), w5_vmem[...],
                    preferred_element_type=jnp.float32)
        o_ref[...] = jnp.tanh(a + pvec_ref[8:9, 0:OUT_PAD])


def acnet_forward(x, params):
    """x: (B, state_size) float32.  params: dict from init_params."""
    B, state_size = x.shape
    action_dim = params["action_dim"]

    inputs = (x, params["w1"], params["wstack"], params["pvec"], params["w5p"])

    flops = 2 * B * (state_size * HIDDEN + N_STREAMED * HIDDEN * HIDDEN + HIDDEN * OUT_PAD)
    bytes_accessed = int(
        x.size * x.dtype.itemsize
        + sum(int(params[k].size) * params[k].dtype.itemsize
              for k in ("w1", "wstack", "pvec", "w5p"))
        + B * OUT_PAD * 4)
    transcendentals = int(B * OUT_PAD + 4 * HIDDEN)   # tanh + rsqrt

    out = pl.pallas_call(
        acnet_kernel,
        out_shape=jax.ShapeDtypeStruct((B, OUT_PAD), jnp.float32),
        grid_spec=pltpu.PrefetchScalarGridSpec(
            num_scalar_prefetch=0,
            grid=(N_STREAMED,),
            in_specs=[
                pl.BlockSpec((B, state_size), lambda k: (0, 0)),        # x (resident)
                pl.BlockSpec((state_size, HIDDEN), lambda k: (0, 0)),   # w1 (resident)
                pl.BlockSpec((None, HIDDEN, HIDDEN), lambda k: (k, 0, 0)),  # w2..w4 streamed
                pl.BlockSpec((9, HIDDEN), lambda k: (0, 0)),            # packed vectors
                pl.BlockSpec(memory_space=pl.ANY),                      # w5p: manual DMA
            ],
            out_specs=pl.BlockSpec((B, OUT_PAD), lambda k: (0, 0)),
            scratch_shapes=[
                pltpu.VMEM((B, HIDDEN), jnp.float32),          # h carried across layers
                pltpu.VMEM((HIDDEN, OUT_PAD), jnp.bfloat16),   # w5 landing buffer
                pltpu.SemaphoreType.DMA,                       # w5 copy completion
            ],
        ),
        compiler_params=pltpu.CompilerParams(dimension_semantics=("arbitrary",)),
        cost_estimate=pl.CostEstimate(flops=flops, transcendentals=transcendentals,
                                      bytes_accessed=bytes_accessed),
    )(*inputs)

    # drop the lane padding, then match torch .squeeze(): drop all size-1 dims.
    return jnp.squeeze(out[:, :action_dim])


def acnet_reference(x, params):
    """Pure-JAX reference mirroring the kernel math (bf16 matmuls, f32 BN)."""
    pv = params["pvec"]
    weights = [params["w1"]] + [params["wstack"][i] for i in range(N_STREAMED)]
    h = x
    for i, w in enumerate(weights):
        h = jnp.dot(h.astype(jnp.bfloat16), w, preferred_element_type=jnp.float32)
        mean = jnp.mean(h, axis=0, keepdims=True)
        var = jnp.mean((h - mean) ** 2, axis=0, keepdims=True)
        h = (h - mean) * jax.lax.rsqrt(var + BN_EPS) * pv[i:i + 1, :] + pv[4 + i:5 + i, :]
        h = jnp.maximum(h, LEAKY_SLOPE * h)
    a = jnp.dot(h.astype(jnp.bfloat16), params["w5p"], preferred_element_type=jnp.float32)
    a = jnp.tanh(a + pv[8:9, :OUT_PAD])
    return jnp.squeeze(a[:, :params["action_dim"]])


def init_params(key, state_size, action_dim):
    """Deterministic synthetic parameters with the shapes ACNet.__init__ defines.

    b1..b4 are not generated (exactly cancelled by training-mode BN mean subtraction).
    Weights are stored in bf16; w2..w4 are stacked contiguously for streaming.
    """
    assert action_dim <= OUT_PAD
    ks = jax.random.split(key, 10)
    scale = 0.05

    def lin_w(k, fan_in, fan_out):
        return (scale * jax.random.normal(k, (fan_in, fan_out), jnp.float32)).astype(jnp.bfloat16)

    p = {"action_dim": action_dim}
    p["w1"] = lin_w(ks[0], state_size, HIDDEN)
    p["wstack"] = jnp.stack(
        [lin_w(ks[1], HIDDEN, HIDDEN),
         lin_w(ks[2], HIDDEN, HIDDEN),
         lin_w(ks[3], HIDDEN, HIDDEN)], axis=0)

    # final layer: weight padded to a lane-dense OUT_PAD slab (zeros past action_dim)
    kw5, kb5 = jax.random.split(ks[4])
    w5 = scale * jax.random.normal(kw5, (HIDDEN, action_dim), jnp.float32)
    w5p = jnp.zeros((HIDDEN, OUT_PAD), jnp.float32).at[:, :action_dim].set(w5)
    p["w5p"] = w5p.astype(jnp.bfloat16)
    b5 = scale * jax.random.normal(kb5, (action_dim,), jnp.float32)

    # packed small vectors: gammas (rows 0..3), betas (rows 4..7), b5 (row 8, lane-padded)
    pvec = jnp.zeros((9, HIDDEN), jnp.float32)
    for i, k in zip(range(4), ks[5:9]):
        kg, kb = jax.random.split(k)
        pvec = pvec.at[i, :].set(1.0 + 0.01 * jax.random.normal(kg, (HIDDEN,), jnp.float32))
        pvec = pvec.at[4 + i, :].set(0.01 * jax.random.normal(kb, (HIDDEN,), jnp.float32))
    pvec = pvec.at[8, :action_dim].set(b5)
    p["pvec"] = pvec
    return p


if __name__ == "__main__":
    state_size = 32
    action_dim = 8
    batch = 16          # B >= 16: fills bf16 sublane packing; per-call cost is ~batch-invariant

    key = jax.random.PRNGKey(0)
    k_params, k_x = jax.random.split(key)

    params = init_params(k_params, state_size, action_dim)
    x = jax.random.normal(k_x, (batch, state_size), jnp.float32)

    out = acnet_forward(x, params)
    out = jax.block_until_ready(out)
    ref = acnet_reference(x, params)

    assert out.shape == (batch, action_dim), out.shape
    assert bool(jnp.all(jnp.isfinite(out)))
    assert bool(jnp.all(jnp.abs(out) <= 1.0))                      # tanh range
    assert bool(jnp.max(jnp.abs(out - ref)) < 5e-3), float(jnp.max(jnp.abs(out - ref)))
    print("KERNEL_OK")
</pallas_src>

<mosaic_0001>
module attributes {stable_mosaic.version = 11 : i64} {
  func.func @acnet_kernel(%arg0: i32, %arg1: memref<16x32xf32, #tpu.memory_space<vmem>>, %arg2: memref<32x512xbf16, #tpu.memory_space<vmem>>, %arg3: memref<1x512x512xbf16, #tpu.memory_space<vmem>>, %arg4: memref<9x512xf32, #tpu.memory_space<vmem>>, %arg5: memref<512x128xbf16, #tpu.memory_space<any>>, %arg6: memref<16x128xf32, #tpu.memory_space<vmem>>, %arg7: memref<16x512xf32, #tpu.memory_space<vmem>>, %arg8: memref<512x128xbf16, #tpu.memory_space<vmem>>, %arg9: memref<!tpu.dma_semaphore, #tpu.memory_space<semaphore_mem>>) attributes {dimension_semantics = [#tpu.dimension_semantics<arbitrary>], iteration_bounds = array<i64: 3>, scalar_prefetch = 0 : i64, scratch_operands = 3 : i64, tpu.core_type = #tpu.core_type<tc>, window_params = [{pipeline_mode = #tpu.pipeline_mode<synchronous>, transform_indices = @transform_0, window_bounds = array<i64: 16, 32>}, {pipeline_mode = #tpu.pipeline_mode<synchronous>, transform_indices = @transform_1, window_bounds = array<i64: 32, 512>}, {transform_indices = @transform_2, window_bounds = array<i64: 1, 512, 512>}, {pipeline_mode = #tpu.pipeline_mode<synchronous>, transform_indices = @transform_3, window_bounds = array<i64: 9, 512>}, {}, {pipeline_mode = #tpu.pipeline_mode<synchronous>, transform_indices = @transform_5, window_bounds = array<i64: 16, 128>}]} {
    %c0_i32 = arith.constant 0 : i32
    %0 = arith.cmpi eq, %arg0, %c0_i32 : i32
    %1 = arith.extui %0 : i1 to i32
    %c0_i32_0 = arith.constant 0 : i32
    %2 = arith.cmpi ne, %1, %c0_i32_0 : i32
    scf.if %2 {
      tpu.enqueue_dma source(%arg5 : memref<512x128xbf16, #tpu.memory_space<any>>) target(%arg8 : memref<512x128xbf16, #tpu.memory_space<vmem>>) target_semaphore(%arg9 : memref<!tpu.dma_semaphore, #tpu.memory_space<semaphore_mem>>)
      %c0_17 = arith.constant 0 : index
      %c0_18 = arith.constant 0 : index
      %44 = vector.load %arg1[%c0_17, %c0_18] : memref<16x32xf32, #tpu.memory_space<vmem>>, vector<16x32xf32>
      %45 = arith.truncf %44 : vector<16x32xf32> to vector<16x32xbf16>
      %c0_19 = arith.constant 0 : index
      %c0_20 = arith.constant 0 : index
      %46 = vector.load %arg2[%c0_19, %c0_20] : memref<32x512xbf16, #tpu.memory_space<vmem>>, vector<32x512xbf16>
      %cst_21 = arith.constant dense<0.000000e+00> : vector<16x512xf32>
      %47 = tpu.matmul %45, %46, %cst_21 {dimension_numbers = #tpu.dot_dimension_numbers<[1], [0], [0], [1], [0, 0, 1, 1], [], []>} : vector<16x32xbf16>, vector<32x512xbf16>, vector<16x512xf32> -> vector<16x512xf32>
      %c0_22 = arith.constant 0 : index
      %c0_23 = arith.constant 0 : index
      %48 = vector.load %arg4[%c0_22, %c0_23] : memref<9x512xf32, #tpu.memory_space<vmem>>, vector<1x512xf32>
      %c4 = arith.constant 4 : index
      %c0_24 = arith.constant 0 : index
      %49 = vector.load %arg4[%c4, %c0_24] : memref<9x512xf32, #tpu.memory_space<vmem>>, vector<1x512xf32>
      %cst_25 = arith.constant dense<0.000000e+00> : vector<512xf32>
      %50 = vector.multi_reduction <add>, %47, %cst_25 [0] : vector<16x512xf32> to vector<512xf32>
      %51 = vector.shape_cast %50 : vector<512xf32> to vector<1x512xf32>
      %52 = arith.mulf %47, %47 : vector<16x512xf32>
      %cst_26 = arith.constant dense<0.000000e+00> : vector<512xf32>
      %53 = vector.multi_reduction <add>, %52, %cst_26 [0] : vector<16x512xf32> to vector<512xf32>
      %54 = vector.shape_cast %53 : vector<512xf32> to vector<1x512xf32>
      %cst_27 = arith.constant 6.250000e-02 : f32
      %55 = vector.broadcast %cst_27 : f32 to vector<1x512xf32>
      %56 = arith.mulf %51, %55 : vector<1x512xf32>
      %cst_28 = arith.constant 6.250000e-02 : f32
      %57 = vector.broadcast %cst_28 : f32 to vector<1x512xf32>
      %58 = arith.mulf %54, %57 : vector<1x512xf32>
      %59 = arith.mulf %56, %56 : vector<1x512xf32>
      %60 = arith.subf %58, %59 : vector<1x512xf32>
      %cst_29 = arith.constant 0.000000e+00 : f32
      %61 = vector.broadcast %cst_29 : f32 to vector<1x512xf32>
      %62 = arith.maximumf %60, %61 : vector<1x512xf32>
      %cst_30 = arith.constant 9.99999974E-6 : f32
      %63 = vector.broadcast %cst_30 : f32 to vector<1x512xf32>
      %64 = arith.addf %62, %63 : vector<1x512xf32>
      %65 = math.rsqrt %64 : vector<1x512xf32>
      %66 = arith.mulf %65, %48 : vector<1x512xf32>
      %67 = vector.broadcast %56 : vector<1x512xf32> to vector<16x512xf32>
      %68 = arith.subf %47, %67 : vector<16x512xf32>
      %69 = vector.broadcast %66 : vector<1x512xf32> to vector<16x512xf32>
      %70 = arith.mulf %68, %69 : vector<16x512xf32>
      %71 = vector.broadcast %49 : vector<1x512xf32> to vector<16x512xf32>
      %72 = arith.addf %70, %71 : vector<16x512xf32>
      %cst_31 = arith.constant 2.000000e-01 : f32
      %73 = vector.broadcast %cst_31 : f32 to vector<16x512xf32>
      %74 = arith.mulf %73, %72 : vector<16x512xf32>
      %75 = arith.maximumf %72, %74 : vector<16x512xf32>
      %c0_32 = arith.constant 0 : index
      %c0_33 = arith.constant 0 : index
      %76 = vector.load %arg7[%c0_32, %c0_33] : memref<16x512xf32, #tpu.memory_space<vmem>>, vector<16x512xf32>
      tpu.vector_store %arg7[%c0_32, %c0_33], %75 {strides = array<i32>} : memref<16x512xf32, #tpu.memory_space<vmem>>, vector<16x512xf32>,
    } else {
    }
    %c1_i32 = arith.constant 1 : i32
    %3 = arith.addi %c1_i32, %arg0 : i32
    %4 = arith.index_cast %3 : i32 to index
    %c0 = arith.constant 0 : index
    %5 = vector.load %arg4[%4, %c0] : memref<9x512xf32, #tpu.memory_space<vmem>>, vector<1x512xf32>
    %c5_i32 = arith.constant 5 : i32
    %6 = arith.addi %c5_i32, %arg0 : i32
    %7 = arith.index_cast %6 : i32 to index
    %c0_1 = arith.constant 0 : index
    %8 = vector.load %arg4[%7, %c0_1] : memref<9x512xf32, #tpu.memory_space<vmem>>, vector<1x512xf32>
    %c0_2 = arith.constant 0 : index
    %c0_3 = arith.constant 0 : index
    %9 = vector.load %arg7[%c0_2, %c0_3] : memref<16x512xf32, #tpu.memory_space<vmem>>, vector<16x512xf32>
    %10 = arith.truncf %9 : vector<16x512xf32> to vector<16x512xbf16>
    %c0_4 = arith.constant 0 : index
    %c0_5 = arith.constant 0 : index
    %c0_6 = arith.constant 0 : index
    %11 = vector.load %arg3[%c0_4, %c0_5, %c0_6] : memref<1x512x512xbf16, #tpu.memory_space<vmem>>, vector<1x512x512xbf16>
    %12 = vector.shape_cast %11 : vector<1x512x512xbf16> to vector<512x512xbf16>
    %cst = arith.constant dense<0.000000e+00> : vector<16x512xf32>
    %13 = tpu.matmul %10, %12, %cst {dimension_numbers = #tpu.dot_dimension_numbers<[1], [0], [0], [1], [0, 0, 1, 1], [], []>} : vector<16x512xbf16>, vector<512x512xbf16>, vector<16x512xf32> -> vector<16x512xf32>
    %cst_7 = arith.constant dense<0.000000e+00> : vector<512xf32>
    %14 = vector.multi_reduction <add>, %13, %cst_7 [0] : vector<16x512xf32> to vector<512xf32>
    %15 = vector.shape_cast %14 : vector<512xf32> to vector<1x512xf32>
    %16 = arith.mulf %13, %13 : vector<16x512xf32>
    %cst_8 = arith.constant dense<0.000000e+00> : vector<512xf32>
    %17 = vector.multi_reduction <add>, %16, %cst_8 [0] : vector<16x512xf32> to vector<512xf32>
    %18 = vector.shape_cast %17 : vector<512xf32> to vector<1x512xf32>
    %cst_9 = arith.constant 6.250000e-02 : f32
    %19 = vector.broadcast %cst_9 : f32 to vector<1x512xf32>
    %20 = arith.mulf %15, %19 : vector<1x512xf32>
    %cst_10 = arith.constant 6.250000e-02 : f32
    %21 = vector.broadcast %cst_10 : f32 to vector<1x512xf32>
    %22 = arith.mulf %18, %21 : vector<1x512xf32>
    %23 = arith.mulf %20, %20 : vector<1x512xf32>
    %24 = arith.subf %22, %23 : vector<1x512xf32>
    %cst_11 = arith.constant 0.000000e+00 : f32
    %25 = vector.broadcast %cst_11 : f32 to vector<1x512xf32>
    %26 = arith.maximumf %24, %25 : vector<1x512xf32>
    %cst_12 = arith.constant 9.99999974E-6 : f32
    %27 = vector.broadcast %cst_12 : f32 to vector<1x512xf32>
    %28 = arith.addf %26, %27 : vector<1x512xf32>
    %29 = math.rsqrt %28 : vector<1x512xf32>
    %30 = arith.mulf %29, %5 : vector<1x512xf32>
    %31 = vector.broadcast %20 : vector<1x512xf32> to vector<16x512xf32>
    %32 = arith.subf %13, %31 : vector<16x512xf32>
    %33 = vector.broadcast %30 : vector<1x512xf32> to vector<16x512xf32>
    %34 = arith.mulf %32, %33 : vector<16x512xf32>
    %35 = vector.broadcast %8 : vector<1x512xf32> to vector<16x512xf32>
    %36 = arith.addf %34, %35 : vector<16x512xf32>
    %cst_13 = arith.constant 2.000000e-01 : f32
    %37 = vector.broadcast %cst_13 : f32 to vector<16x512xf32>
    %38 = arith.mulf %37, %36 : vector<16x512xf32>
    %39 = arith.maximumf %36, %38 : vector<16x512xf32>
    %c0_14 = arith.constant 0 : index
    %c0_15 = arith.constant 0 : index
    %40 = vector.load %arg7[%c0_14, %c0_15] : memref<16x512xf32, #tpu.memory_space<vmem>>, vector<16x512xf32>
    tpu.vector_store %arg7[%c0_14, %c0_15], %39 {strides = array<i32>} : memref<16x512xf32, #tpu.memory_space<vmem>>, vector<16x512xf32>,
    %c2_i32 = arith.constant 2 : i32
    %41 = arith.cmpi eq, %arg0, %c2_i32 : i32
    %42 = arith.extui %41 : i1 to i32
    %c0_i32_16 = arith.constant 0 : i32
    %43 = arith.cmpi ne, %42, %c0_i32_16 : i32
    scf.if %43 {
      tpu.wait_dma2 semaphore(%arg9 : memref<!tpu.dma_semaphore, #tpu.memory_space<semaphore_mem>>) src(%arg5 : memref<512x128xbf16, #tpu.memory_space<any>>) dst(%arg8 : memref<512x128xbf16, #tpu.memory_space<vmem>>)
      %c0_17 = arith.constant 0 : index
      %c0_18 = arith.constant 0 : index
      %44 = vector.load %arg7[%c0_17, %c0_18] : memref<16x512xf32, #tpu.memory_space<vmem>>, vector<16x512xf32>
      %45 = arith.truncf %44 : vector<16x512xf32> to vector<16x512xbf16>
      %c0_19 = arith.constant 0 : index
      %c0_20 = arith.constant 0 : index
      %46 = vector.load %arg8[%c0_19, %c0_20] : memref<512x128xbf16, #tpu.memory_space<vmem>>, vector<512x128xbf16>
      %cst_21 = arith.constant dense<0.000000e+00> : vector<16x128xf32>
      %47 = tpu.matmul %45, %46, %cst_21 {dimension_numbers = #tpu.dot_dimension_numbers<[1], [0], [0], [1], [0, 0, 1, 1], [], []>} : vector<16x512xbf16>, vector<512x128xbf16>, vector<16x128xf32> -> vector<16x128xf32>
      %c8 = arith.constant 8 : index
      %c0_22 = arith.constant 0 : index
      %48 = vector.load %arg4[%c8, %c0_22] : memref<9x512xf32, #tpu.memory_space<vmem>>, vector<1x128xf32>
      %49 = vector.broadcast %48 : vector<1x128xf32> to vector<16x128xf32>
      %50 = arith.addf %47, %49 : vector<16x128xf32>
      %51 = math.tanh %50 : vector<16x128xf32>
      %c0_23 = arith.constant 0 : index
      %c0_24 = arith.constant 0 : index
      %52 = vector.load %arg6[%c0_23, %c0_24] : memref<16x128xf32, #tpu.memory_space<vmem>>, vector<16x128xf32>
      tpu.vector_store %arg6[%c0_23, %c0_24], %51 {strides = array<i32>} : memref<16x128xf32, #tpu.memory_space<vmem>>, vector<16x128xf32>,
    } else {
    }
    return
  }
  func.func @transform_0(%arg0: i32) -> (i32, i32) {
    %c0_i32 = arith.constant 0 : i32
    %c0_i32_0 = arith.constant 0 : i32
    %c0_i32_1 = arith.constant 0 : i32
    return %c0_i32, %c0_i32_0 : i32, i32
  }
  func.func @transform_1(%arg0: i32) -> (i32, i32) {
    %c0_i32 = arith.constant 0 : i32
    %c0_i32_0 = arith.constant 0 : i32
    %c0_i32_1 = arith.constant 0 : i32
    return %c0_i32, %c0_i32_0 : i32, i32
  }
  func.func @transform_2(%arg0: i32) -> (i32, i32, i32) {
    %c0_i32 = arith.constant 0 : i32
    %c0_i32_0 = arith.constant 0 : i32
    %c0_i32_1 = arith.constant 0 : i32
    return %arg0, %c0_i32, %c0_i32_0 : i32, i32, i32
  }
  func.func @transform_3(%arg0: i32) -> (i32, i32) {
    %c0_i32 = arith.constant 0 : i32
    %c0_i32_0 = arith.constant 0 : i32
    %c0_i32_1 = arith.constant 0 : i32
    return %c0_i32, %c0_i32_0 : i32, i32
  }
  func.func @transform_5(%arg0: i32) -> (i32, i32) {
    %c0_i32 = arith.constant 0 : i32
    %c0_i32_0 = arith.constant 0 : i32
    %c0_i32_1 = arith.constant 0 : i32
    return %c0_i32, %c0_i32_0 : i32, i32
  }
}

</mosaic_0001>

<bundles_post_ra>
// kernel: tpu_custom_call.1
= control target key start
LH: loop header
LB: loop body
LE: loop exit
PB: predicated region body
PF: predicated region fallthrough
CT: control target
= control target key end

     0   :  { %10 = vsyncpa [#allocation6], 0  ;;  %s3545_s0 = inlined_call_operand.hbm [shape: f32[16,32], index: 0, kind: input, shape index: {}]   ;;  %s3546_s1 = inlined_call_operand.hbm [shape: bf16[32,512], index: 1, kind: input, shape index: {}]   ;;  %s3547_s2 = inlined_call_operand.hbm [shape: bf16[3,512,512], index: 2, kind: input, shape index: {}]   ;;  %s3548_s3 = inlined_call_operand.hbm [shape: f32[9,512], index: 3, kind: input, shape index: {}]   ;;  %s3549_s4 = inlined_call_operand.hbm [shape: bf16[512,128], index: 4, kind: input, shape index: {}]   ;;  %s3550_s5 = inlined_call_operand.hbm [shape: f32[16,128], index: 5, kind: output, shape index: {}]  }
   0x1   :  { %11 = vsyncpa [#allocation9], 0 }
   0x2   :  { %12 = vsyncpa [#allocation7], 0  ;;  %s3078_s18 = smov 0   ;;  %s3080_s19 = smov 0  }
   0x3   :  { %s3082_s20 = smov 0   ;;  %s3084_s21 = smov 0  }
   0x4 LB: > { %s3097_s22 = sadd.s32 4294967295, %s3031_s21   ;;  %s3100_s23 = sadd.s32 1, %s3031_s21   ;;  %s3031_s21 = sphi %s3084_s21, %s3575_s21   ;;  %s3027_s20 = sphi %s3082_s20, %s3574_s20   ;;  %s3023_s19 = sphi %s3080_s19, %s3573_s19   ;;  %s3019_s18 = sphi %s3078_s18, %s3572_s18  }
   0x5   : > { %s64_s24 = ssub.s32 %s3031_s21, %s3100_s23  ;;  %s67_s25 = sadd.s32 1, %s3027_s20 }
   0x6   : > { %p65_p0 = scmp.eq.s32.totalorder %s64_s24, 0  ;;  %p74_p1 = scmp.ne.s32.totalorder %s3027_s20, %s3023_s19 }
   0x7   : > { %p75_p2 = scmp.eq.s32.totalorder %s3031_s21, 0  ;;  %p80_p3 = scmp.ne.s32.totalorder %s3023_s19, %s3019_s18 }
   0x8   : > { %s3110_s26 = scalar_select %p65_p0, %s3027_s20, %s67_s25  }
   0x9   : > { %p3112_p4 = por %p75_p2, %p74_p1  ;;  %p3551_p5 = scmp.eq.s32.totalorder %s3097_s22, 0 }
   0xa   : > { %p2245_p6 = scmp.ge.s32.totalorder %s3031_s21, 1  ;;  %p133_p7 = scmp.lt.s32.totalorder %s3031_s21, 4 }
   0xb   : > { %p3121_p8 = por %p3551_p5, %p80_p3  ;;  %s3033_s30 = smov [#allocation5]  }
   0xc   : > { %p3126_p10 = pnand %p2245_p6, %p133_p7  ;;  %s145_s6 = sshll.u32 %s3033_s30, 4  ;;  %s146_s6 = int_to_ptr.vmem [resolvable:$true] %s145_s6 }
   0xd   : > { %s3557_s28 = scalar_select %p3121_p8, 1, 0 }
   0xe   : > { %s3558_s29 = scalar_select %p3126_p10, 1, 0 }
   0xf   : > { %p2504_p11 = pneg %p3126_p10  ;;  %p2521_p13 = scmp.lt.s32.totalorder %s3031_s21, 3 }
  0x10   : > { %s2840_s9 = scalar_lea.vmem %s146_s6, 256  ;;  %p2848_p7 = scmp.lt.s32.totalorder %s146_s6, %s146_s6 }
  0x11   : > { %p3134_p12 = pnand %p2504_p11, %p3551_p5  ;;  %p3141_p0 = pnand %p2521_p13, %p3112_p4 }
  0x12   : > { %p2841_p2 = scmp.ne.s32.totalorder %s146_s6, %s2840_s9  ;;  %p2849_p11 = scmp.lt.s32.totalorder %s2840_s9, %s2840_s9 }
  0x13   : > { %p2831_p1 = pneg %p3134_p12 }
  0x14   : > { %p2850_p9 = por %p2849_p11, %p2848_p7 }
  0x15   : > { %p2843_p3 = pnand %p2841_p2, %p2831_p1 }
  0x17   : > { %p2844_p6 = pneg %p2843_p3 }
  0x19   : > { %p2851_p5 = pnand %p2850_p9, %p2844_p6 }
  0x1b   : > { %2854 = shalt.err (!%p2851_p5)
}
  0x1c   : > { %s3034_s10 = smov 128   ;;  %s3035_s11 = smov 8  }
  0x1d   : > { %2507 = dma.hbm_to_vmem [thread:$0]  (!%p3134_p12), %s3545_s0, 256, %s146_s6, [#allocation6], %s3034_s10, %s3034_s10, %s3035_s11  }
  0x1e   : > { %s3036_s14 = smov [#allocation8]  }
  0x1f   : > { %s158_s15 = sshll.u32 %s3036_s14, 4  ;;  %s159_s15 = int_to_ptr.vmem [resolvable:$true] %s158_s15 }
  0x20   : > { %s2866_s16 = scalar_lea.vmem %s159_s15, 1024  ;;  %p2874_p9 = scmp.lt.s32.totalorder %s159_s15, %s159_s15 }
  0x21   : > { %p2867_p4 = scmp.ne.s32.totalorder %s159_s15, %s2866_s16  ;;  %p2875_p5 = scmp.lt.s32.totalorder %s2866_s16, %s2866_s16 }
  0x23   : > { %p2869_p13 = pnand %p2867_p4, %p2831_p1  ;;  %p2876_p3 = por %p2875_p5, %p2874_p9 }
  0x25   : > { %p2870_p2 = pneg %p2869_p13 }
  0x27   : > { %p2877_p6 = pnand %p2876_p3, %p2870_p2 }
  0x29   : > { %2880 = shalt.err (!%p2877_p6)
}
  0x2a   : > { %s3552_s17 = smov 256   ;;  %s3553_s18 = smov 16  }
  0x2b   : > { %2510 = dma.hbm_to_vmem [thread:$0]  (!%p3134_p12), %s3546_s1, 1024, %s159_s15, [#allocation9], %s3552_s17, %s3552_s17, %s3553_s18  }
  0x2c   : > { %s3039_s27 = smov [#allocation11]   ;;  %s185_s6 = sand.u32 1, %s3031_s21  }
  0x2d   : > { %s171_s30 = sshll.u32 %s3039_s27, 4  ;;  %s172_s30 = int_to_ptr.vmem [resolvable:$true] %s171_s30 }
  0x2e   : > { %s2892_s9 = scalar_lea.vmem %s172_s30, 1024  ;;  %p2900_p13 = scmp.lt.s32.totalorder %s172_s30, %s172_s30 }
  0x2f   : > { %p2893_p7 = scmp.ne.s32.totalorder %s172_s30, %s2892_s9  ;;  %p2901_p2 = scmp.lt.s32.totalorder %s2892_s9, %s2892_s9 }
  0x31   : > { %p2895_p11 = pnand %p2893_p7, %p2831_p1  ;;  %p2902_p9 = por %p2901_p2, %p2900_p13 }
  0x33   : > { %p2896_p4 = pneg %p2895_p11 }
  0x35   : > { %p2903_p5 = pnand %p2902_p9, %p2896_p4 }
  0x37   : > { %2906 = shalt.err (!%p2903_p5)
}
  0x38   : > { %s3040_s10 = smov 512   ;;  %s3041_s11 = smov 32  }
  0x39   : > { %2513 = dma.hbm_to_vmem [thread:$0]  (!%p3134_p12), %s3548_s3, 1024, %s172_s30, [#allocation9], %s3040_s10, %s3040_s10, %s3041_s11  }
  0x3a   : > { %s187_s14 = sand.u32 1, %s3027_s20   ;;  %s2439_s16 = sshll.u32 %s3031_s21, 14 }
  0x3b   : > { %s2250_s15 = sshll.u32 %s187_s14, 10  ;;  %s3180_s27 = scalar_lea.hbm %s3547_s2, %s2439_s16 }
  0x3c   : > { %s189_s9 = scalar_lea.vmem [#allocation10], %s2250_s15  ;;  %s3184_s7 = scalar_lea.sflag [#allocation6], %s185_s6 }
  0x3d   : > { %s196_s17 = sshll.u32 %s189_s9, 4  ;;  %s2907_s18 = scalar_lea.hbm %s3180_s27, 16384  ;;  %s3182_s17 = int_to_ptr.vmem [resolvable:$true] %s196_s17 }
  0x3e   : > { %p2908_p1 = scmp.ne.s32.totalorder %s3180_s27, %s2907_s18  ;;  %p2909_p12 = pneg %p3141_p0 }
  0x3f   : > { %s2912_s10 = scalar_lea.hbm %s3547_s2, 49152  ;;  %p2913_p7 = scmp.lt.s32.totalorder %s3180_s27, %s3547_s2 }
  0x40   : > { %p2910_p3 = pnand %p2909_p12, %p2908_p1  ;;  %p2914_p11 = scmp.lt.s32.totalorder %s2912_s10, %s2907_s18 }
  0x42   : > { %p2911_p6 = pneg %p2910_p3  ;;  %p2915_p4 = por %p2914_p11, %p2913_p7 }
  0x44   : > { %p2916_p13 = pnand %p2915_p4, %p2911_p6 }
  0x46   : > { %2919 = shalt.err (!%p2916_p13)
}
  0x47   : > { %s2920_s6 = scalar_lea.vmem %s3182_s17, 16384  ;;  %s3042_s13 = smov [#allocation10]  }
  0x48   : > { %p2921_p2 = scmp.ne.s32.totalorder %s3182_s17, %s2920_s6  ;;  %s2925_s14 = sshll.u32 %s3042_s13, 4  ;;  %s2926_s14 = int_to_ptr.vmem [resolvable:$false] %s2925_s14 }
  0x49   : > { %s2927_s15 = scalar_lea.vmem %s2926_s14, 32768  ;;  %p2928_p1 = scmp.lt.s32.totalorder %s3182_s17, %s2926_s14 }
  0x4a   : > { %p2923_p9 = pnand %p2921_p2, %p2909_p12  ;;  %p2929_p3 = scmp.lt.s32.totalorder %s2927_s15, %s2920_s6 }
  0x4c   : > { %p2924_p5 = pneg %p2923_p9  ;;  %p2930_p8 = por %p2929_p3, %p2928_p1 }
  0x4e   : > { %p2931_p10 = pnand %p2930_p8, %p2924_p5 }
  0x50   : > { %2934 = shalt.err (!%p2931_p10)
}
  0x51   : > { %s3561_s18 = smov 16   ;;  %s3562_s16 = smov 256  }
  0x52   : > { %2517 = dma.hbm_to_vmem [thread:$0]  (!%p3141_p0), %s3180_s27, 16384, %s3182_s17, %s3184_s7, %s3562_s16, %s3562_s16, %s3561_s18  }
  0x53   : > { %p3563_p12 = scmp.ne.s32.totalorder %s3558_s29, 0 }
  0x54   : > { %p3564_p6 = scmp.eq.s32.totalorder (!%p3563_p12), %s3097_s22, 0 }
  0x55   : > { %208 = sbr.rel (%p3563_p12) target bundleno = 1024 (0x400), region = 36 }
  0x5a   : > { %2996 = dma.done.wait (%p3564_p6), [#allocation6], 256   ;;  %p3565_p7 = pmov %p3564_p6 }
  0x5b   : > { %p3566_p8 = pmov %p3564_p6 }
  0x5c   : > { %2998 = vsyncadd (%p3565_p7), [#allocation6], 4294967040 }
  0x5d   : > { %3000 = dma.done.wait (%p3566_p8), [#allocation9], 1024   ;;  %p3567_p10 = pmov %p3564_p6 }
  0x5e   : > { %s218_s8 = sand.u32 1, %s3097_s22   ;;  %s220_s17 = sand.u32 1, %s3023_s19  }
  0x5f   : > { %3002 = vsyncadd (%p3567_p10), [#allocation9], 4294966272  ;;  %s2256_s24 = sshll.u32 %s220_s17, 10  ;;  %s219_s29 = scalar_lea.sflag [#allocation6], %s218_s8 }
  0x60   : > { %s3220_s25 = scalar_lea.vmem [#allocation10], %s2256_s24  ;;  %p3568_p0 = scmp.ne.s32.totalorder %s3557_s28, 0 }
  0x62   : > { %3004 = dma.done.wait (%p3568_p0), %s219_s29, 16384  }
  0x63   : > { %3006 = vsyncadd (%p3568_p0), %s219_s29, 4294950912  ;;  %p3569_p11 = pmov %p3564_p6 }
  0x64   : > { %p3570_p4 = pmov %p3564_p6 }
  0x65   : > { %3008 = dma.done.wait (%p3569_p11), [#allocation9], 1024  }
  0x66   : > { %3010 = vsyncadd (%p3570_p4), [#allocation9], 4294966272  ;;  %p3571_p13 = scmp.ne.s32.totalorder %s3097_s22, 0 }
  0x67   : > { %s3044_s28 = smov (!%p3571_p13), [#allocation3]  }
  0x68   : > { %250 = sbr.rel (%p3571_p13) target bundleno = 371 (0x173), region = 56  ;;  %s258_s27 = sshll.u32 (!%p3571_p13), %s3044_s28, 4  ;;  %s259_s27 = int_to_ptr.vmem [resolvable:$true] %s258_s27 }
  0x69   : > { %s2943_s9 = scalar_lea.vmem (!%p3571_p13), %s259_s27, 4096  ;;  %p2948_p9 = scmp.lt.s32.totalorder (!%p3571_p13), %s259_s27, %s259_s27 }
  0x6a   : > { %p2944_p2 = scmp.ne.s32.totalorder (!%p3571_p13), %s259_s27, %s2943_s9  ;;  %p2949_p5 = scmp.lt.s32.totalorder (!%p3571_p13), %s2943_s9, %s2943_s9 }
  0x6c   : > { %p2950_p1 = por (!%p3571_p13), %p2949_p5, %p2948_p9 }
  0x6d   : > { %v2573_v0 = vld [vmem:[#allocation8 + $0x24] ss:$16 sps:$4 sm:$0xff]   ;;  %v2575_v1 = vld [vmem:[#allocation8 + $0x2c] ss:$16 sps:$4 sm:$0xff]   ;;  %v3043_v2 = vmov 0   ;;  %vm313_vm0 = vcmask 261120  }
  0x6e   : > { %349 = vmatprep.mubr.bf16.mxu0 %v3043_v2  ;;  %392 = vmatprep.mubr.bf16.mxu1 %v3043_v2  ;;  %v2577_v3 = vld [vmem:[#allocation8 + $0x20] ss:$16 sps:$4 sm:$0xff]   ;;  %v2578_v4 = vld [vmem:[#allocation8 + $0x28] ss:$16 sps:$4 sm:$0xff]   ;;  %v2579_v5 = vld [vmem:[#allocation8 + $0x4] ss:$16 sps:$4 sm:$0xff]   ;;  %p2951_p3 = pnand %p2950_p1, %p2944_p2 }
  0x6f   : > { %329 = vmatprep.subr.bf16.mxu0 %v2573_v0  ;;  %372 = vmatprep.subr.bf16.mxu1 %v2575_v1  ;;  %v2581_v6 = vld [vmem:[#allocation8 + $0xc] ss:$16 sps:$4 sm:$0xff]   ;;  %v2583_v7 = vld [vmem:[#allocation8] ss:$16 sps:$4 sm:$0xff]   ;;  %v2584_v8 = vld [vmem:[#allocation8 + $0x8] ss:$16 sps:$4 sm:$0xff]  }
  0x70   : > { %330 = vmatpush1.bf16.msra.mxu0 %v2577_v3  ;;  %373 = vmatpush1.bf16.msra.mxu1 %v2578_v4  ;;  %v262_v9 = vld [vmem:[#allocation5] sm:$0xff]  ;;  %v263_v10 = vld [vmem:[#allocation5 + $0x8] sm:$0xff] }
  0x71   : > { %331 = vmatprep.subr.bf16.mxu0 %v2579_v5  ;;  %374 = vmatprep.subr.bf16.mxu1 %v2581_v6  ;;  %v264_v11 = vpack.c.bf16 %v263_v10, %v262_v9 }
  0x74   : > { %332 = vmatpush1.bf16.msra.mxu0 %v2583_v7  ;;  %375 = vmatpush1.bf16.msra.mxu1 %v2584_v8 }
  0x77   : > { %2267 = vmatmul.mubr.msk.bf16.vlgmr.msra.gmra.mxu0 %vm313_vm0, %v264_v11  ;;  %2268 = vmatmul.mubr.msk.bf16.vlgmr.msra.gmra.mxu1 %vm313_vm0, %v264_v11 }
  0x78   : > { %2954 = shalt.err (!%p2951_p3)  }
  0x79   : > { %261 = dma.hbm_to_vmem [thread:$0]  %s3549_s4, 4096, %s259_s27, [#allocation4] }
 0x137   : > { %v3235_v12 = vpop.f32.mrf.mxu0  ;;  %v3237_v13 = vpop.f32.mrf.mxu1 }
 0x138   : > { %v434_v16 = vmul.f32 %v3235_v12, %v3235_v12  ;;  %v436_v17 = vmul.f32 %v3237_v13, %v3237_v13 }
 0x139   : > { %v3239_v14 = vpop.f32.mrf.mxu0  ;;  %v3241_v15 = vpop.f32.mrf.mxu1 }
 0x13a   : > { %v435_v24 = vmul.f32 %v3239_v14, %v3239_v14  ;;  %v437_v25 = vmul.f32 %v3241_v15, %v3241_v15 }
 0x13b   : > { %v3247_v18 = vpop.f32.mrf.mxu0  ;;  %v3249_v19 = vpop.f32.mrf.mxu1 }
 0x13c   : > { %v406_v20 = vadd.f32 %v3247_v18, %v3235_v12  ;;  %v438_v21 = vmul.f32 %v3247_v18, %v3247_v18  ;;  %v420_v22 = vadd.f32 %v3249_v19, %v3237_v13  ;;  %v440_v23 = vmul.f32 %v3249_v19, %v3249_v19 }
 0x13d   : > { %v3263_v26 = vpop.f32.mrf.mxu0  ;;  %v3265_v27 = vpop.f32.mrf.mxu1 }
 0x13e   : > { %v407_v28 = vrot.slane %v406_v20, 4  ;;  %v442_v29 = vadd.f32 %v438_v21, %v434_v16  ;;  %v421_v30 = vrot.slane %v420_v22, 4  ;;  %v456_v31 = vadd.f32 %v440_v23, %v436_v17 }
 0x13f   : > { %v413_v32 = vadd.f32 %v3263_v26, %v3239_v14  ;;  %v439_v33 = vmul.f32 %v3263_v26, %v3263_v26  ;;  %v427_v34 = vadd.f32 %v3265_v27, %v3241_v15  ;;  %v441_v35 = vmul.f32 %v3265_v27, %v3265_v27 }
 0x140   : > { %v408_v36 = vadd.f32 %v407_v28, %v406_v20  ;;  %v443_v37 = vrot.slane %v442_v29, 4  ;;  %v422_v38 = vadd.f32 %v421_v30, %v420_v22  ;;  %v457_v39 = vrot.slane %v456_v31, 4 }
 0x141   : > { %v414_v40 = vrot.slane %v413_v32, 4  ;;  %v449_v41 = vadd.f32 %v439_v33, %v435_v24  ;;  %v428_v42 = vrot.slane %v427_v34, 4  ;;  %v463_v43 = vadd.f32 %v441_v35, %v437_v25 }
 0x142   : > { %v409_v44 = vrot.slane %v408_v36, 2  ;;  %v444_v45 = vadd.f32 %v443_v37, %v442_v29  ;;  %v423_v46 = vrot.slane %v422_v38, 2  ;;  %v458_v47 = vadd.f32 %v457_v39, %v456_v31 }
 0x143   : > { %v415_v48 = vadd.f32 %v414_v40, %v413_v32  ;;  %v450_v49 = vrot.slane %v449_v41, 4  ;;  %v429_v50 = vadd.f32 %v428_v42, %v427_v34  ;;  %v464_v51 = vrot.slane %v463_v43, 4 }
 0x144   : > { %v410_v52 = vadd.f32 %v409_v44, %v408_v36  ;;  %v445_v53 = vrot.slane %v444_v45, 2  ;;  %v424_v54 = vadd.f32 %v423_v46, %v422_v38  ;;  %v459_v55 = vrot.slane %v458_v47, 2 }
 0x145   : > { %v416_v56 = vrot.slane %v415_v48, 2  ;;  %v451_v57 = vadd.f32 %v450_v49, %v449_v41  ;;  %v430_v58 = vrot.slane %v429_v50, 2  ;;  %v465_v59 = vadd.f32 %v464_v51, %v463_v43 }
 0x146   : > { %v411_v60 = vrot.slane %v410_v52, 1  ;;  %v446_v61 = vadd.f32 %v445_v53, %v444_v45  ;;  %v425_v62 = vrot.slane %v424_v54, 1  ;;  %v460_v63 = vadd.f32 %v459_v55, %v458_v47  ;;  %v403_v55 = vld [vmem:[#allocation11] ss:$8 sm:$0xf] }
 0x147   : > { %v417_v0 = vadd.f32 %v416_v56, %v415_v48  ;;  %v452_v1 = vrot.slane %v451_v57, 2  ;;  %v431_v2 = vadd.f32 %v430_v58, %v429_v50  ;;  %v466_v3 = vrot.slane %v465_v59, 2 }
 0x148   : > { %v412_v4 = vadd.f32 %v411_v60, %v410_v52  ;;  %v447_v5 = vrot.slane %v446_v61, 1  ;;  %v426_v6 = vadd.f32 %v425_v62, %v424_v54  ;;  %v461_v7 = vrot.slane %v460_v63, 1 }
 0x149   : > { %v418_v8 = vrot.slane %v417_v0, 1  ;;  %v453_v9 = vadd.f32 %v452_v1, %v451_v57  ;;  %v432_v10 = vrot.slane %v431_v2, 1  ;;  %v467_v11 = vadd.f32 %v466_v3, %v465_v59 }
 0x14a   : > { %v448_v16 = vadd.f32 %v447_v5, %v446_v61  ;;  %v3275_v17 = vmul.f32 0.0625, %v412_v4  ;;  %v462_v20 = vadd.f32 %v461_v7, %v460_v63  ;;  %v3277_v21 = vmul.f32 0.0625, %v426_v6  ;;  %v405_v61 = vld [vmem:[#allocation11 + $0x4] ss:$8 sm:$0xf] }
 0x14b   : > { %v419_v22 = vadd.f32 %v418_v8, %v417_v0  ;;  %v454_v23 = vrot.slane %v453_v9, 1  ;;  %v433_v24 = vadd.f32 %v432_v10, %v431_v2  ;;  %v468_v25 = vrot.slane %v467_v11, 1 }
 0x14c   : > { %v474_v28 = vmul.f32 0.0625, %v448_v16  ;;  %v478_v29 = vmul.f32 %v3275_v17, %v3275_v17  ;;  %v476_v30 = vmul.f32 0.0625, %v462_v20  ;;  %v480_v31 = vmul.f32 %v3277_v21, %v3277_v21 }
 0x14d   : > { %v455_v33 = vadd.f32 %v454_v23, %v453_v9  ;;  %v3283_v34 = vmul.f32 0.0625, %v419_v22  ;;  %v469_v35 = vadd.f32 %v468_v25, %v467_v11  ;;  %v3285_v37 = vmul.f32 0.0625, %v433_v24 }
 0x14e   : > { %v482_v32 = vsub.f32 %v474_v28, %v478_v29  ;;  %v484_v36 = vsub.f32 %v476_v30, %v480_v31  ;;  %v499_v45 = vlaneseq  ;;  %v523_v6 = vsub.f32 %v3235_v12, %v3275_v17 }
 0x14f   : > { %v475_v39 = vmul.f32 0.0625, %v455_v33  ;;  %v479_v40 = vmul.f32 %v3283_v34, %v3283_v34  ;;  %v477_v42 = vmul.f32 0.0625, %v469_v35  ;;  %v481_v43 = vmul.f32 %v3285_v37, %v3285_v37 }
 0x150   : > { %v486_v38 = vmax.f32 %v482_v32, 0.0  ;;  %v488_v41 = vmax.f32 %v484_v36, 0.0  ;;  %v500_v51 = vshrl.u32 %v499_v45, 7  ;;  %v527_v7 = vsub.f32 %v3247_v18, %v3275_v17 }
 0x151   : > { %v483_v46 = vsub.f32 %v475_v39, %v479_v40  ;;  %v485_v48 = vsub.f32 %v477_v42, %v481_v43  ;;  %v525_v11 = vsub.f32 %v3237_v13, %v3277_v21  ;;  %v529_v16 = vsub.f32 %v3249_v19, %v3277_v21 }
 0x152   : > { %v490_v44 = vadd.f32 1e-05, %v486_v38  ;;  %v492_v47 = vadd.f32 1e-05, %v488_v41  ;;  %v501_v54 = vsub.s32 0, %v500_v51  ;;  %v509_v56 = vsub.s32 2, %v500_v51 }
 0x153   : > { %v487_v49 = vmax.f32 %v483_v46, 0.0  ;;  %v489_v50 = vmax.f32 %v485_v48, 0.0  ;;  %v505_v58 = vsub.s32 1, %v500_v51  ;;  %v513_v60 = vsub.s32 3, %v500_v51 }
 0x154   : > { %2585 = vrsqrt.f32 %v490_v44  ;;  %v502_v57 = vrot.slane %v403_v55, %v501_v54  ;;  %v510_v59 = vrot.slane %v403_v55, %v509_v56  ;;  %v559_v2 = vrot.slane %v405_v61, %v501_v54 }
 0x155   : > { %2587 = vrsqrt.f32 %v492_v47  ;;  %v491_v52 = vadd.f32 1e-05, %v487_v49  ;;  %v493_v53 = vadd.f32 1e-05, %v489_v50  ;;  %v506_v1 = vrot.slane %v403_v55, %v505_v58 }
 0x156   : > { %v567_v4 = vrot.slane %v405_v61, %v509_v56  ;;  %v514_v5 = vrot.slane %v403_v55, %v513_v60  ;;  %v563_v9 = vrot.slane %v405_v61, %v505_v58  ;;  %v571_v22 = vrot.slane %v405_v61, %v513_v60 }
 0x157   : > { %2589 = vrsqrt.f32 %v491_v52  ;;  %v524_v12 = vsub.f32 %v3239_v14, %v3283_v34  ;;  %v528_v17 = vsub.f32 %v3263_v26, %v3283_v34  ;;  %v526_v19 = vsub.f32 %v3241_v15, %v3285_v37 }
 0x158   : > { %2591 = vrsqrt.f32 %v493_v53  ;;  %v530_v35 = vsub.f32 %v3265_v27, %v3285_v37 }
 0x161   : > { %v2586_v62 = vpop.eup %2585 }
 0x162   : > { %v2588_v63 = vpop.eup %2587  ;;  %v519_v0 = vmul.f32 %v2586_v62, %v502_v57 }
 0x163   : > { %v521_v3 = vmul.f32 %v2588_v63, %v510_v59 }
 0x164   : > { %v534_v8 = vrot.slane %v519_v0, %v501_v54  ;;  %v2590_v10 = vpop.eup %2589 }
 0x165   : > { %v542_v20 = vrot.slane %v521_v3, %v501_v54  ;;  %v2592_v23 = vpop.eup %2591  ;;  %v520_v28 = vmul.f32 %v2590_v10, %v506_v1 }
 0x166   : > { %v547_v24 = vmul.f32 %v534_v8, %v523_v6  ;;  %v551_v25 = vmul.f32 %v534_v8, %v527_v7  ;;  %v522_v30 = vmul.f32 %v2592_v23, %v514_v5 }
 0x167   : > { %v549_v29 = vmul.f32 %v542_v20, %v525_v11  ;;  %v553_v18 = vmul.f32 %v542_v20, %v529_v16  ;;  %v538_v32 = vrot.slane %v520_v28, %v501_v54 }
 0x168   : > { %v576_v31 = vadd.f32 %v559_v2, %v547_v24  ;;  %v580_v13 = vadd.f32 %v559_v2, %v551_v25  ;;  %v546_v36 = vrot.slane %v522_v30, %v501_v54 }
 0x169   : > { %v578_v21 = vadd.f32 %v567_v4, %v549_v29  ;;  %v582_v33 = vadd.f32 %v567_v4, %v553_v18  ;;  %v548_v39 = vmul.f32 %v538_v32, %v524_v12  ;;  %v552_v40 = vmul.f32 %v538_v32, %v528_v17 }
 0x16a   : > { %v584_v38 = vmul.f32 0.2, %v576_v31  ;;  %v588_v14 = vmul.f32 0.2, %v580_v13  ;;  %v550_v26 = vmul.f32 %v546_v36, %v526_v19  ;;  %v554_v34 = vmul.f32 %v546_v36, %v530_v35 }
 0x16b   : > { %v586_v41 = vmul.f32 0.2, %v578_v21  ;;  %v590_v42 = vmul.f32 0.2, %v582_v33  ;;  %v577_v45 = vadd.f32 %v563_v9, %v548_v39  ;;  %v581_v46 = vadd.f32 %v563_v9, %v552_v40 }
 0x16c   : > { %v592_v43 = vmax.f32 %v576_v31, %v584_v38  ;;  %v596_v44 = vmax.f32 %v580_v13, %v588_v14  ;;  %v579_v48 = vadd.f32 %v571_v22, %v550_v26  ;;  %v583_v49 = vadd.f32 %v571_v22, %v554_v34 }
 0x16d   : > { %v594_v47 = vmax.f32 %v578_v21, %v586_v41  ;;  %v598_v15 = vmax.f32 %v582_v33, %v590_v42  ;;  %v585_v27 = vmul.f32 0.2, %v577_v45  ;;  %v589_v37 = vmul.f32 0.2, %v581_v46 }
 0x16e   : > { %600 = vst [vmem:[#allocation2 + $0x30] sm:$0xff] %v592_v43  ;;  %604 = vst [vmem:[#allocation2 + $0x8] sm:$0xff] %v596_v44  ;;  %v587_v50 = vmul.f32 0.2, %v579_v48  ;;  %v591_v51 = vmul.f32 0.2, %v583_v49 }
 0x16f   : > { %602 = vst [vmem:[#allocation2 + $0x18] sm:$0xff] %v594_v47  ;;  %606 = vst [vmem:[#allocation2 + $0x28] sm:$0xff] %v598_v15  ;;  %v593_v52 = vmax.f32 %v577_v45, %v585_v27  ;;  %v597_v53 = vmax.f32 %v581_v46, %v589_v37 }
 0x170   : > { %v595_v54 = vmax.f32 %v579_v48, %v587_v50  ;;  %v599_v55 = vmax.f32 %v583_v49, %v591_v51 }
 0x171   : > { %601 = vst [vmem:[#allocation2] sm:$0xff] %v593_v52  ;;  %605 = vst [vmem:[#allocation2 + $0x20] sm:$0xff] %v597_v53 }
 0x172   : > { %603 = vst [vmem:[#allocation2 + $0x10] sm:$0xff] %v595_v54  ;;  %607 = vst [vmem:[#allocation2 + $0x38] sm:$0xff] %v599_v55 }
 0x173 PF: > { %v2593_v56 = vld [vmem:[%s3220_s25 + $0xe4] ss:$16 sps:$4 sm:$0xff]   ;;  %v2597_v58 = vld [vmem:[%s3220_s25 + $0xe0] ss:$16 sps:$4 sm:$0xff]   ;;  %s608_s30 = sadd.s32 1, %s3097_s22  ;;  %s618_s11 = sadd.s32 5, %s3097_s22 }
 0x174   : > { %v2595_v57 = vld [vmem:[%s3220_s25 + $0x2e4] ss:$16 sps:$4 sm:$0xff]   ;;  %1408 = vmatprep.subr.bf16.mxu0 %v2593_v56  ;;  %v2598_v59 = vld [vmem:[%s3220_s25 + $0x2e0] ss:$16 sps:$4 sm:$0xff]   ;;  %s609_s10 = sshra.s32 %s608_s30, 3  ;;  %s612_s12 = sand.u32 7, %s608_s30 }
 0x175   : > { %1451 = vmatprep.subr.bf16.mxu1 %v2595_v57  ;;  %v2599_v60 = vld [vmem:[%s3220_s25 + $0xc4] ss:$16 sps:$4 sm:$0xff]   ;;  %1409 = vmatpush1.bf16.msra.mxu0 %v2597_v58  ;;  %v2603_v62 = vld [vmem:[%s3220_s25 + $0xc0] ss:$16 sps:$4 sm:$0xff]   ;;  %s2440_s6 = sshll.u32 %s609_s10, 5  ;;  %s619_s14 = sshra.s32 %s618_s11, 3 }
 0x176   : > { %1452 = vmatpush1.bf16.msra.mxu1 %v2598_v59  ;;  %v2601_v61 = vld [vmem:[%s3220_s25 + $0x2c4] ss:$16 sps:$4 sm:$0xff]   ;;  %1410 = vmatprep.subr.bf16.mxu0 %v2599_v60  ;;  %v2604_v63 = vld [vmem:[%s3220_s25 + $0x2c0] ss:$16 sps:$4 sm:$0xff]   ;;  %s615_s13 = sadd.s32 %s2440_s6, %s612_s12  ;;  %s622_s15 = sand.u32 7, %s618_s11 }
 0x177   : > { %1453 = vmatprep.subr.bf16.mxu1 %v2601_v61  ;;  %v2605_v0 = vld [vmem:[%s3220_s25 + $0xa4] ss:$16 sps:$4 sm:$0xff]   ;;  %v2609_v2 = vld [vmem:[%s3220_s25 + $0xa0] ss:$16 sps:$4 sm:$0xff]   ;;  %s2441_s18 = sshll.u32 %s619_s14, 5  ;;  %s616_s16 = scalar_lea.vmem [#allocation11], %s615_s13 }
 0x178   : > { %v2607_v1 = vld [vmem:[%s3220_s25 + $0x2a4] ss:$16 sps:$4 sm:$0xff]   ;;  %v2610_v3 = vld [vmem:[%s3220_s25 + $0x2a0] ss:$16 sps:$4 sm:$0xff]   ;;  %s625_s8 = sadd.s32 %s2441_s18, %s622_s15  ;;  %p2401_p12 = scmp.ne.s32.totalorder %s3097_s22, 2 }
 0x179   : > { %1411 = vmatpush1.bf16.msra.mxu0 %v2603_v62  ;;  %v2611_v4 = vld [vmem:[%s3220_s25 + $0x84] ss:$16 sps:$4 sm:$0xff]   ;;  %v2615_v6 = vld [vmem:[%s3220_s25 + $0x80] ss:$16 sps:$4 sm:$0xff]   ;;  %v635_v44 = vld [vmem:[#allocation2 + $0x38] sm:$0xff]  ;;  %s626_s17 = scalar_lea.vmem [#allocation11], %s625_s8 }
 0x17a   : > { %1454 = vmatpush1.bf16.msra.mxu1 %v2604_v63  ;;  %1412 = vmatprep.subr.bf16.mxu0 %v2605_v0  ;;  %v2613_v5 = vld [vmem:[%s3220_s25 + $0x284] ss:$16 sps:$4 sm:$0xff]   ;;  %v2616_v7 = vld [vmem:[%s3220_s25 + $0x280] ss:$16 sps:$4 sm:$0xff]   ;;  %v632_v63 = vld [vmem:[#allocation2 + $0x8] sm:$0xff] }
 0x17b   : > { %1455 = vmatprep.subr.bf16.mxu1 %v2607_v1  ;;  %v2617_v8 = vld [vmem:[%s3220_s25 + $0x64] ss:$16 sps:$4 sm:$0xff]   ;;  %v2621_v10 = vld [vmem:[%s3220_s25 + $0x60] ss:$16 sps:$4 sm:$0xff]   ;;  %v630_v0 = vld [vmem:[#allocation2 + $0x18] sm:$0xff] }
 0x17c   : > { %v2619_v9 = vld [vmem:[%s3220_s25 + $0x264] ss:$16 sps:$4 sm:$0xff]   ;;  %v2622_v11 = vld [vmem:[%s3220_s25 + $0x260] ss:$16 sps:$4 sm:$0xff]   ;;  %v634_v1 = vld [vmem:[#allocation2 + $0x28] sm:$0xff] }
 0x17d   : > { %1413 = vmatpush1.bf16.msra.mxu0 %v2609_v2  ;;  %v2623_v16 = vld [vmem:[%s3220_s25 + $0x44] ss:$16 sps:$4 sm:$0xff]   ;;  %v2627_v22 = vld [vmem:[%s3220_s25 + $0x40] ss:$16 sps:$4 sm:$0xff]   ;;  %v2691_v2 = vld [vmem:[%s3220_s25 + $0xec] ss:$16 sps:$4 sm:$0xff]  }
 0x17e   : > { %1456 = vmatpush1.bf16.msra.mxu1 %v2610_v3  ;;  %1414 = vmatprep.subr.bf16.mxu0 %v2611_v4  ;;  %v2625_v20 = vld [vmem:[%s3220_s25 + $0x244] ss:$16 sps:$4 sm:$0xff]   ;;  %v2628_v23 = vld [vmem:[%s3220_s25 + $0x240] ss:$16 sps:$4 sm:$0xff]   ;;  %v2694_v3 = vld [vmem:[%s3220_s25 + $0x2ec] ss:$16 sps:$4 sm:$0xff]  }
 0x17f   : > { %1457 = vmatprep.subr.bf16.mxu1 %v2613_v5  ;;  %v2629_v24 = vld [vmem:[%s3220_s25 + $0x24] ss:$16 sps:$4 sm:$0xff]   ;;  %v2633_v28 = vld [vmem:[%s3220_s25 + $0x20] ss:$16 sps:$4 sm:$0xff]   ;;  %v3375_v5 = vpack.c.bf16 %v634_v1, %v630_v0  ;;  %v2781_v0 = vld [vmem:[%s3220_s25 + $0x10c] ss:$16 sps:$4 sm:$0xff]  }
 0x180   : > { %v2631_v25 = vld [vmem:[%s3220_s25 + $0x224] ss:$16 sps:$4 sm:$0xff]   ;;  %v2634_v12 = vld [vmem:[%s3220_s25 + $0x220] ss:$16 sps:$4 sm:$0xff]   ;;  %v2784_v1 = vld [vmem:[%s3220_s25 + $0x30c] ss:$16 sps:$4 sm:$0xff]  }
 0x181   : > { %1415 = vmatpush1.bf16.msra.mxu0 %v2615_v6  ;;  %v2635_v29 = vld [vmem:[%s3220_s25 + $0x4] ss:$16 sps:$4 sm:$0xff]   ;;  %v2639_v17 = vld [vmem:[%s3220_s25] ss:$16 sps:$4 sm:$0xff]   ;;  %v2689_v6 = vld [vmem:[%s3220_s25 + $0xe8] ss:$16 sps:$4 sm:$0xff]  }
 0x182   : > { %1458 = vmatpush1.bf16.msra.mxu1 %v2616_v7  ;;  %1416 = vmatprep.subr.bf16.mxu0 %v2617_v8  ;;  %v2637_v18 = vld [vmem:[%s3220_s25 + $0x204] ss:$16 sps:$4 sm:$0xff]   ;;  %v2640_v30 = vld [vmem:[%s3220_s25 + $0x200] ss:$16 sps:$4 sm:$0xff]   ;;  %v2692_v7 = vld [vmem:[%s3220_s25 + $0x2e8] ss:$16 sps:$4 sm:$0xff]  }
 0x183   : > { %1459 = vmatprep.subr.bf16.mxu1 %v2619_v9  ;;  %v2641_v31 = vld [vmem:[%s3220_s25 + $0x1e4] ss:$16 sps:$4 sm:$0xff]   ;;  %v2645_v32 = vld [vmem:[%s3220_s25 + $0x1e0] ss:$16 sps:$4 sm:$0xff]   ;;  %v2697_v8 = vld [vmem:[%s3220_s25 + $0xcc] ss:$16 sps:$4 sm:$0xff]  }
 0x184   : > { %v2643_v13 = vld [vmem:[%s3220_s25 + $0x3e4] ss:$16 sps:$4 sm:$0xff]   ;;  %v2646_v19 = vld [vmem:[%s3220_s25 + $0x3e0] ss:$16 sps:$4 sm:$0xff]   ;;  %v2700_v9 = vld [vmem:[%s3220_s25 + $0x2cc] ss:$16 sps:$4 sm:$0xff]  }
 0x185   : > { %1417 = vmatpush1.bf16.msra.mxu0 %v2621_v10  ;;  %v2647_v21 = vld [vmem:[%s3220_s25 + $0x1c4] ss:$16 sps:$4 sm:$0xff]   ;;  %v2651_v35 = vld [vmem:[%s3220_s25 + $0x1c0] ss:$16 sps:$4 sm:$0xff]   ;;  %v2695_v10 = vld [vmem:[%s3220_s25 + $0xc8] ss:$16 sps:$4 sm:$0xff]  }
 0x186   : > { %1460 = vmatpush1.bf16.msra.mxu1 %v2622_v11  ;;  %1418 = vmatprep.subr.bf16.mxu0 %v2623_v16  ;;  %v2649_v33 = vld [vmem:[%s3220_s25 + $0x3c4] ss:$16 sps:$4 sm:$0xff]   ;;  %v2652_v36 = vld [vmem:[%s3220_s25 + $0x3c0] ss:$16 sps:$4 sm:$0xff]   ;;  %v2698_v11 = vld [vmem:[%s3220_s25 + $0x2c8] ss:$16 sps:$4 sm:$0xff]  }
 0x187   : > { %1461 = vmatprep.subr.bf16.mxu1 %v2625_v20  ;;  %v2653_v38 = vld [vmem:[%s3220_s25 + $0x1a4] ss:$16 sps:$4 sm:$0xff]   ;;  %v2657_v39 = vld [vmem:[%s3220_s25 + $0x1a0] ss:$16 sps:$4 sm:$0xff]   ;;  %v2703_v16 = vld [vmem:[%s3220_s25 + $0xac] ss:$16 sps:$4 sm:$0xff]  }
 0x188   : > { %v2655_v14 = vld [vmem:[%s3220_s25 + $0x3a4] ss:$16 sps:$4 sm:$0xff]   ;;  %v2658_v40 = vld [vmem:[%s3220_s25 + $0x3a0] ss:$16 sps:$4 sm:$0xff]   ;;  %v2706_v20 = vld [vmem:[%s3220_s25 + $0x2ac] ss:$16 sps:$4 sm:$0xff]  }
 0x189   : > { %1419 = vmatpush1.bf16.msra.mxu0 %v2627_v22  ;;  %v2659_v41 = vld [vmem:[%s3220_s25 + $0x184] ss:$16 sps:$4 sm:$0xff]   ;;  %v2663_v45 = vld [vmem:[%s3220_s25 + $0x180] ss:$16 sps:$4 sm:$0xff]   ;;  %v2701_v22 = vld [vmem:[%s3220_s25 + $0xa8] ss:$16 sps:$4 sm:$0xff]  }
 0x18a   : > { %1462 = vmatpush1.bf16.msra.mxu1 %v2628_v23  ;;  %1420 = vmatprep.subr.bf16.mxu0 %v2629_v24  ;;  %v2661_v42 = vld [vmem:[%s3220_s25 + $0x384] ss:$16 sps:$4 sm:$0xff]   ;;  %v2664_v46 = vld [vmem:[%s3220_s25 + $0x380] ss:$16 sps:$4 sm:$0xff]   ;;  %v2704_v23 = vld [vmem:[%s3220_s25 + $0x2a8] ss:$16 sps:$4 sm:$0xff]  }
 0x18b   : > { %1463 = vmatprep.subr.bf16.mxu1 %v2631_v25  ;;  %v629_v26 = vld [vmem:[#allocation2] sm:$0xff]  ;;  %v631_v43 = vld [vmem:[#allocation2 + $0x10] sm:$0xff]  ;;  %v2709_v24 = vld [vmem:[%s3220_s25 + $0x8c] ss:$16 sps:$4 sm:$0xff]  }
 0x18c   : > { %v633_v34 = vld [vmem:[#allocation2 + $0x20] sm:$0xff]  ;;  %v639_v48 = vpack.c.bf16 %v635_v44, %v631_v43  ;;  %v628_v62 = vld [vmem:[#allocation2 + $0x30] sm:$0xff]  ;;  %v2712_v25 = vld [vmem:[%s3220_s25 + $0x28c] ss:$16 sps:$4 sm:$0xff]  }
 0x18d   : > { %1421 = vmatpush1.bf16.msra.mxu0 %v2633_v28  ;;  %v2665_v47 = vld [vmem:[%s3220_s25 + $0x164] ss:$16 sps:$4 sm:$0xff]   ;;  %v637_v15 = vpack.c.bf16 %v633_v34, %v629_v26  ;;  %v2669_v27 = vld [vmem:[%s3220_s25 + $0x160] ss:$16 sps:$4 sm:$0xff]   ;;  %v3373_v4 = vpack.c.bf16 %v632_v63, %v628_v62  ;;  %v2707_v28 = vld [vmem:[%s3220_s25 + $0x88] ss:$16 sps:$4 sm:$0xff]  }
 0x18e   : > { %1464 = vmatpush1.bf16.msra.mxu1 %v2634_v12  ;;  %1422 = vmatprep.subr.bf16.mxu0 %v2635_v29  ;;  %v2667_v49 = vld [vmem:[%s3220_s25 + $0x364] ss:$16 sps:$4 sm:$0xff]   ;;  %v2670_v37 = vld [vmem:[%s3220_s25 + $0x360] ss:$16 sps:$4 sm:$0xff]   ;;  %v2710_v12 = vld [vmem:[%s3220_s25 + $0x288] ss:$16 sps:$4 sm:$0xff]  }
 0x18f   : > { %1465 = vmatprep.subr.bf16.mxu1 %v2637_v18  ;;  %1440 = vmatprep.mubr.bf16.mxu0 %v637_v15  ;;  %v2671_v50 = vld [vmem:[%s3220_s25 + $0x144] ss:$16 sps:$4 sm:$0xff]   ;;  %v2675_v52 = vld [vmem:[%s3220_s25 + $0x140] ss:$16 sps:$4 sm:$0xff]   ;;  %v2715_v29 = vld [vmem:[%s3220_s25 + $0x6c] ss:$16 sps:$4 sm:$0xff]  }
 0x190   : > { %1483 = vmatprep.mubr.bf16.mxu1 %v639_v48  ;;  %v2673_v51 = vld [vmem:[%s3220_s25 + $0x344] ss:$16 sps:$4 sm:$0xff]   ;;  %v2676_v53 = vld [vmem:[%s3220_s25 + $0x340] ss:$16 sps:$4 sm:$0xff]   ;;  %v2718_v18 = vld [vmem:[%s3220_s25 + $0x26c] ss:$16 sps:$4 sm:$0xff]  }
 0x191   : > { %1423 = vmatpush1.bf16.msra.mxu0 %v2639_v17  ;;  %v2677_v54 = vld [vmem:[%s3220_s25 + $0x124] ss:$16 sps:$4 sm:$0xff]   ;;  %v2681_v56 = vld [vmem:[%s3220_s25 + $0x120] ss:$16 sps:$4 sm:$0xff]   ;;  %v2713_v17 = vld [vmem:[%s3220_s25 + $0x68] ss:$16 sps:$4 sm:$0xff]  }
 0x192   : > { %1466 = vmatpush1.bf16.msra.mxu1 %v2640_v30  ;;  %1424 = vmatprep.subr.bf16.mxu0 %v2641_v31  ;;  %v2679_v55 = vld [vmem:[%s3220_s25 + $0x324] ss:$16 sps:$4 sm:$0xff]   ;;  %v2682_v57 = vld [vmem:[%s3220_s25 + $0x320] ss:$16 sps:$4 sm:$0xff]   ;;  %v2716_v30 = vld [vmem:[%s3220_s25 + $0x268] ss:$16 sps:$4 sm:$0xff]  }
 0x193   : > { %1467 = vmatprep.subr.bf16.mxu1 %v2643_v13  ;;  %v2683_v58 = vld [vmem:[%s3220_s25 + $0x104] ss:$16 sps:$4 sm:$0xff]   ;;  %v2687_v60 = vld [vmem:[%s3220_s25 + $0x100] ss:$16 sps:$4 sm:$0xff]   ;;  %v2721_v31 = vld [vmem:[%s3220_s25 + $0x4c] ss:$16 sps:$4 sm:$0xff]  }
 0x194   : > { %v2685_v59 = vld [vmem:[%s3220_s25 + $0x304] ss:$16 sps:$4 sm:$0xff]   ;;  %v2688_v61 = vld [vmem:[%s3220_s25 + $0x300] ss:$16 sps:$4 sm:$0xff]   ;;  %v2724_v13 = vld [vmem:[%s3220_s25 + $0x24c] ss:$16 sps:$4 sm:$0xff]  }
 0x195   : > { %1425 = vmatpush2.bf16.msra.mxu0 %v2645_v32  ;;  %v2719_v32 = vld [vmem:[%s3220_s25 + $0x48] ss:$16 sps:$4 sm:$0xff]   ;;  %v2745_v43 = vld [vmem:[%s3220_s25 + $0x1cc] ss:$16 sps:$4 sm:$0xff]  }
 0x196   : > { %1468 = vmatpush2.bf16.msra.mxu1 %v2646_v19  ;;  %1426 = vmatprep.subr.bf16.mxu0 %v2647_v21  ;;  %v2722_v19 = vld [vmem:[%s3220_s25 + $0x248] ss:$16 sps:$4 sm:$0xff]   ;;  %v2727_v21 = vld [vmem:[%s3220_s25 + $0x2c] ss:$16 sps:$4 sm:$0xff]  }
 0x197   : > { %1469 = vmatprep.subr.bf16.mxu1 %v2649_v33  ;;  %v2730_v33 = vld [vmem:[%s3220_s25 + $0x22c] ss:$16 sps:$4 sm:$0xff]   ;;  %v2737_v26 = vld [vmem:[%s3220_s25 + $0x1e8] ss:$16 sps:$4 sm:$0xff]  }
 0x198   : > { %v2740_v34 = vld [vmem:[%s3220_s25 + $0x3e8] ss:$16 sps:$4 sm:$0xff]   ;;  %v2748_v44 = vld [vmem:[%s3220_s25 + $0x3cc] ss:$16 sps:$4 sm:$0xff]  }
 0x199   : > { %1427 = vmatpush2.bf16.msra.mxu0 %v2651_v35  ;;  %v2725_v35 = vld [vmem:[%s3220_s25 + $0x28] ss:$16 sps:$4 sm:$0xff]  }
 0x19a   : > { %1470 = vmatpush2.bf16.msra.mxu1 %v2652_v36  ;;  %1428 = vmatprep.subr.bf16.mxu0 %v2653_v38  ;;  %v2728_v36 = vld [vmem:[%s3220_s25 + $0x228] ss:$16 sps:$4 sm:$0xff]   ;;  %v2733_v38 = vld [vmem:[%s3220_s25 + $0xc] ss:$16 sps:$4 sm:$0xff]  }
 0x19b   : > { %1471 = vmatprep.subr.bf16.mxu1 %v2655_v14  ;;  %v2736_v14 = vld [vmem:[%s3220_s25 + $0x20c] ss:$16 sps:$4 sm:$0xff]   ;;  %v2773_v62 = vld [vmem:[%s3220_s25 + $0x128] ss:$16 sps:$4 sm:$0xff]  }
 0x19c   : > { %v2776_v63 = vld [vmem:[%s3220_s25 + $0x328] ss:$16 sps:$4 sm:$0xff]  }
 0x19d   : > { %1429 = vmatpush2.bf16.msra.mxu0 %v2657_v39  ;;  %v2731_v39 = vld [vmem:[%s3220_s25 + $0x8] ss:$16 sps:$4 sm:$0xff]  }
 0x19e   : > { %1472 = vmatpush2.bf16.msra.mxu1 %v2658_v40  ;;  %1430 = vmatprep.subr.bf16.mxu0 %v2659_v41  ;;  %v2734_v40 = vld [vmem:[%s3220_s25 + $0x208] ss:$16 sps:$4 sm:$0xff]   ;;  %v2739_v41 = vld [vmem:[%s3220_s25 + $0x1ec] ss:$16 sps:$4 sm:$0xff]  }
 0x19f   : > { %1473 = vmatprep.subr.bf16.mxu1 %v2661_v42  ;;  %v2742_v42 = vld [vmem:[%s3220_s25 + $0x3ec] ss:$16 sps:$4 sm:$0xff]  }
 0x1a1   : > { %1431 = vmatpush2.bf16.msra.mxu0 %v2663_v45  ;;  %v2743_v45 = vld [vmem:[%s3220_s25 + $0x1c8] ss:$16 sps:$4 sm:$0xff]  }
 0x1a2   : > { %1474 = vmatpush2.bf16.msra.mxu1 %v2664_v46  ;;  %1432 = vmatprep.subr.bf16.mxu0 %v2665_v47  ;;  %v2746_v46 = vld [vmem:[%s3220_s25 + $0x3c8] ss:$16 sps:$4 sm:$0xff]   ;;  %v2751_v47 = vld [vmem:[%s3220_s25 + $0x1ac] ss:$16 sps:$4 sm:$0xff]  }
 0x1a3   : > { %1475 = vmatprep.subr.bf16.mxu1 %v2667_v49  ;;  %v2752_v49 = vld [vmem:[%s3220_s25 + $0x3a8] ss:$16 sps:$4 sm:$0xff]  }
 0x1a5   : > { %1433 = vmatpush2.bf16.msra.mxu0 %v2669_v27  ;;  %v2757_v27 = vld [vmem:[%s3220_s25 + $0x18c] ss:$16 sps:$4 sm:$0xff]  }
 0x1a6   : > { %1476 = vmatpush2.bf16.msra.mxu1 %v2670_v37  ;;  %1434 = vmatprep.subr.bf16.mxu0 %v2671_v50  ;;  %v2760_v37 = vld [vmem:[%s3220_s25 + $0x38c] ss:$16 sps:$4 sm:$0xff]   ;;  %v2755_v50 = vld [vmem:[%s3220_s25 + $0x188] ss:$16 sps:$4 sm:$0xff]  }
 0x1a7   : > { %1477 = vmatprep.subr.bf16.mxu1 %v2673_v51  ;;  %v2758_v51 = vld [vmem:[%s3220_s25 + $0x388] ss:$16 sps:$4 sm:$0xff]  }
 0x1a9   : > { %1435 = vmatpush2.bf16.msra.mxu0 %v2675_v52  ;;  %v2763_v52 = vld [vmem:[%s3220_s25 + $0x16c] ss:$16 sps:$4 sm:$0xff]  }
 0x1aa   : > { %1478 = vmatpush2.bf16.msra.mxu1 %v2676_v53  ;;  %1436 = vmatprep.subr.bf16.mxu0 %v2677_v54  ;;  %v2766_v53 = vld [vmem:[%s3220_s25 + $0x36c] ss:$16 sps:$4 sm:$0xff]   ;;  %v2761_v54 = vld [vmem:[%s3220_s25 + $0x168] ss:$16 sps:$4 sm:$0xff]  }
 0x1ab   : > { %1479 = vmatprep.subr.bf16.mxu1 %v2679_v55  ;;  %v2764_v55 = vld [vmem:[%s3220_s25 + $0x368] ss:$16 sps:$4 sm:$0xff]  }
 0x1ad   : > { %1437 = vmatpush2.bf16.msra.mxu0 %v2681_v56  ;;  %v2769_v56 = vld [vmem:[%s3220_s25 + $0x14c] ss:$16 sps:$4 sm:$0xff]  }
 0x1ae   : > { %1480 = vmatpush2.bf16.msra.mxu1 %v2682_v57  ;;  %1438 = vmatprep.subr.bf16.mxu0 %v2683_v58  ;;  %v2772_v57 = vld [vmem:[%s3220_s25 + $0x34c] ss:$16 sps:$4 sm:$0xff]   ;;  %v2767_v58 = vld [vmem:[%s3220_s25 + $0x148] ss:$16 sps:$4 sm:$0xff]  }
 0x1af   : > { %1481 = vmatprep.subr.bf16.mxu1 %v2685_v59  ;;  %v2770_v59 = vld [vmem:[%s3220_s25 + $0x348] ss:$16 sps:$4 sm:$0xff]  }
 0x1b1   : > { %1439 = vmatpush2.bf16.msra.mxu0 %v2687_v60  ;;  %v2775_v60 = vld [vmem:[%s3220_s25 + $0x12c] ss:$16 sps:$4 sm:$0xff]  }
 0x1b2   : > { %1482 = vmatpush2.bf16.msra.mxu1 %v2688_v61  ;;  %1494 = vmatprep.subr.bf16.mxu0 %v2691_v2  ;;  %v2778_v61 = vld [vmem:[%s3220_s25 + $0x32c] ss:$16 sps:$4 sm:$0xff]   ;;  %v2779_v2 = vld [vmem:[%s3220_s25 + $0x108] ss:$16 sps:$4 sm:$0xff]  }
 0x1b3   : > { %1537 = vmatprep.subr.bf16.mxu1 %v2694_v3  ;;  %v2782_v3 = vld [vmem:[%s3220_s25 + $0x308] ss:$16 sps:$4 sm:$0xff]  }
 0x1b4   : > { %1441 = vmatmul.mubr.bf16.vlgmr.msra.gmra.mxu0 %v3373_v4 }
 0x1b5   : > { %1484 = vmatmul.mubr.bf16.vlgmr.msra.gmra.mxu1 %v3375_v5  ;;  %1495 = vmatpush1.bf16.msra.mxu0 %v2689_v6 }
 0x1b6   : > { %1538 = vmatpush1.bf16.msra.mxu1 %v2692_v7  ;;  %1496 = vmatprep.subr.bf16.mxu0 %v2697_v8 }
 0x1b7   : > { %1539 = vmatprep.subr.bf16.mxu1 %v2700_v9  ;;  %1526 = vmatprep.mubr.bf16.mxu0 %v637_v15  ;;  %v2754_v15 = vld [vmem:[%s3220_s25 + $0x3ac] ss:$16 sps:$4 sm:$0xff]  }
 0x1b8   : > { %1569 = vmatprep.mubr.bf16.mxu1 %v639_v48  ;;  %v2749_v48 = vld [vmem:[%s3220_s25 + $0x1a8] ss:$16 sps:$4 sm:$0xff]  }
 0x1b9   : > { %1497 = vmatpush1.bf16.msra.mxu0 %v2695_v10 }
 0x1ba   : > { %1540 = vmatpush1.bf16.msra.mxu1 %v2698_v11  ;;  %1498 = vmatprep.subr.bf16.mxu0 %v2703_v16 }
 0x1bb   : > { %1541 = vmatprep.subr.bf16.mxu1 %v2706_v20 }
 0x1bd   : > { %1499 = vmatpush1.bf16.msra.mxu0 %v2701_v22 }
 0x1be   : > { %1542 = vmatpush1.bf16.msra.mxu1 %v2704_v23  ;;  %1500 = vmatprep.subr.bf16.mxu0 %v2709_v24 }
 0x1bf   : > { %1543 = vmatprep.subr.bf16.mxu1 %v2712_v25 }
 0x1c1   : > { %1501 = vmatpush1.bf16.msra.mxu0 %v2707_v28 }
 0x1c2   : > { %1544 = vmatpush1.bf16.msra.mxu1 %v2710_v12  ;;  %1502 = vmatprep.subr.bf16.mxu0 %v2715_v29 }
 0x1c3   : > { %1545 = vmatprep.subr.bf16.mxu1 %v2718_v18 }
 0x1c5   : > { %1503 = vmatpush1.bf16.msra.mxu0 %v2713_v17 }
 0x1c6   : > { %1546 = vmatpush1.bf16.msra.mxu1 %v2716_v30  ;;  %1504 = vmatprep.subr.bf16.mxu0 %v2721_v31 }
 0x1c7   : > { %1547 = vmatprep.subr.bf16.mxu1 %v2724_v13 }
 0x1c9   : > { %1505 = vmatpush1.bf16.msra.mxu0 %v2719_v32 }
 0x1ca   : > { %1548 = vmatpush1.bf16.msra.mxu1 %v2722_v19  ;;  %1506 = vmatprep.subr.bf16.mxu0 %v2727_v21 }
 0x1cb   : > { %1549 = vmatprep.subr.bf16.mxu1 %v2730_v33 }
 0x1cd   : > { %1507 = vmatpush1.bf16.msra.mxu0 %v2725_v35 }
 0x1ce   : > { %1550 = vmatpush1.bf16.msra.mxu1 %v2728_v36  ;;  %1508 = vmatprep.subr.bf16.mxu0 %v2733_v38 }
 0x1cf   : > { %1551 = vmatprep.subr.bf16.mxu1 %v2736_v14 }
 0x1d1   : > { %1509 = vmatpush1.bf16.msra.mxu0 %v2731_v39 }
 0x1d2   : > { %1552 = vmatpush1.bf16.msra.mxu1 %v2734_v40  ;;  %1510 = vmatprep.subr.bf16.mxu0 %v2739_v41 }
 0x1d3   : > { %1553 = vmatprep.subr.bf16.mxu1 %v2742_v42 }
 0x1d5   : > { %1511 = vmatpush2.bf16.msra.mxu0 %v2737_v26 }
 0x1d6   : > { %1554 = vmatpush2.bf16.msra.mxu1 %v2740_v34  ;;  %1512 = vmatprep.subr.bf16.mxu0 %v2745_v43 }
 0x1d7   : > { %1555 = vmatprep.subr.bf16.mxu1 %v2748_v44 }
 0x1d9   : > { %1513 = vmatpush2.bf16.msra.mxu0 %v2743_v45 }
 0x1da   : > { %1556 = vmatpush2.bf16.msra.mxu1 %v2746_v46  ;;  %1514 = vmatprep.subr.bf16.mxu0 %v2751_v47 }
 0x1db   : > { %1557 = vmatprep.subr.bf16.mxu1 %v2754_v15 }
 0x1dd   : > { %1515 = vmatpush2.bf16.msra.mxu0 %v2749_v48 }
 0x1de   : > { %1558 = vmatpush2.bf16.msra.mxu1 %v2752_v49  ;;  %1516 = vmatprep.subr.bf16.mxu0 %v2757_v27 }
 0x1df   : > { %1559 = vmatprep.subr.bf16.mxu1 %v2760_v37 }
 0x1e1   : > { %1517 = vmatpush2.bf16.msra.mxu0 %v2755_v50 }
 0x1e2   : > { %1560 = vmatpush2.bf16.msra.mxu1 %v2758_v51  ;;  %1518 = vmatprep.subr.bf16.mxu0 %v2763_v52 }
 0x1e3   : > { %1561 = vmatprep.subr.bf16.mxu1 %v2766_v53 }
 0x1e5   : > { %1519 = vmatpush2.bf16.msra.mxu0 %v2761_v54 }
 0x1e6   : > { %1562 = vmatpush2.bf16.msra.mxu1 %v2764_v55  ;;  %1520 = vmatprep.subr.bf16.mxu0 %v2769_v56 }
 0x1e7   : > { %1563 = vmatprep.subr.bf16.mxu1 %v2772_v57 }
 0x1e9   : > { %1521 = vmatpush2.bf16.msra.mxu0 %v2767_v58  ;;  %v1673_v58 = vlaneseq }
 0x1ea   : > { %1564 = vmatpush2.bf16.msra.mxu1 %v2770_v59  ;;  %1522 = vmatprep.subr.bf16.mxu0 %v2775_v60 }
 0x1eb   : > { %1565 = vmatprep.subr.bf16.mxu1 %v2778_v61  ;;  %v3465_v61 = vshrl.u32 %v1673_v58, 7 }
 0x1ed   : > { %1523 = vmatpush2.bf16.msra.mxu0 %v2773_v62  ;;  %v3468_v62 = vsub.s32 0, %v3465_v61 }
 0x1ee   : > { %1566 = vmatpush2.bf16.msra.mxu1 %v2776_v63  ;;  %1524 = vmatprep.subr.bf16.mxu0 %v2781_v0  ;;  %v3470_v63 = vld [vmem:[%s616_s16] ss:$8 sm:$0xf]  ;;  %v1679_v0 = vsub.s32 1, %v3465_v61 }
 0x1ef   : > { %1567 = vmatprep.subr.bf16.mxu1 %v2784_v1  ;;  %v1676_v1 = vrot.slane %v3470_v63, %v3468_v62 }
 0x1f1   : > { %1525 = vmatpush2.bf16.msra.mxu0 %v2779_v2 }
 0x1f2   : > { %1568 = vmatpush2.bf16.msra.mxu1 %v2782_v3  ;;  %v3475_v3 = vld [vmem:[%s626_s17] ss:$8 sm:$0xf] }
 0x1f4   : > { %1527 = vmatmul.mubr.bf16.vlgmr.msra.gmra.mxu0 %v3373_v4 }
 0x1f5   : > { %1570 = vmatmul.mubr.bf16.vlgmr.msra.gmra.mxu1 %v3375_v5 }
 0x274   : > { %v1442_v6 = vpop.f32.mrf.mxu0 }
 0x275   : > { %v1485_v7 = vpop.f32.mrf.mxu1 }
 0x276   : > { %v1444_v8 = vpop.f32.mrf.mxu0  ;;  %v3443_v10 = vadd.f32 %v1485_v7, %v1442_v6  ;;  %v1680_v6 = vrot.slane %v3470_v63, %v1679_v0 }
 0x277   : > { %v1487_v9 = vpop.f32.mrf.mxu1 }
 0x278   : > { %v3445_v11 = vadd.f32 %v1487_v9, %v1444_v8  ;;  %v1446_v16 = vpop.f32.mrf.mxu0  ;;  %v1608_v25 = vmul.f32 %v3443_v10, %v3443_v10 }
 0x279   : > { %v1489_v20 = vpop.f32.mrf.mxu1 }
 0x27a   : > { %v3447_v22 = vadd.f32 %v1489_v20, %v1446_v16  ;;  %v1448_v23 = vpop.f32.mrf.mxu0  ;;  %v1609_v12 = vmul.f32 %v3445_v11, %v3445_v11 }
 0x27b   : > { %v1491_v24 = vpop.f32.mrf.mxu1 }
 0x27c   : > { %v1580_v4 = vadd.f32 %v3447_v22, %v3443_v10  ;;  %v1612_v5 = vmul.f32 %v3447_v22, %v3447_v22  ;;  %v3455_v28 = vadd.f32 %v1491_v24, %v1448_v23  ;;  %v1733_v23 = vrot.slane %v3475_v3, %v3468_v62 }
 0x27e   : > { %v1581_v29 = vrot.slane %v1580_v4, 4  ;;  %v1616_v18 = vadd.f32 %v1612_v5, %v1608_v25  ;;  %v1587_v17 = vadd.f32 %v3455_v28, %v3445_v11  ;;  %v1613_v30 = vmul.f32 %v3455_v28, %v3455_v28 }
 0x280   : > { %v1582_v31 = vadd.f32 %v1581_v29, %v1580_v4  ;;  %v1617_v13 = vrot.slane %v1616_v18, 4  ;;  %v1588_v32 = vrot.slane %v1587_v17, 4  ;;  %v1623_v19 = vadd.f32 %v1613_v30, %v1609_v12 }
 0x282   : > { %v1583_v21 = vrot.slane %v1582_v31, 2  ;;  %v1618_v33 = vadd.f32 %v1617_v13, %v1616_v18  ;;  %v1589_v35 = vadd.f32 %v1588_v32, %v1587_v17  ;;  %v1624_v36 = vrot.slane %v1623_v19, 4 }
 0x283   : > { %v1737_v18 = vrot.slane %v3475_v3, %v1679_v0 }
 0x284   : > { %v1584_v38 = vadd.f32 %v1583_v21, %v1582_v31  ;;  %v1619_v14 = vrot.slane %v1618_v33, 2  ;;  %v1590_v39 = vrot.slane %v1589_v35, 2  ;;  %v1625_v40 = vadd.f32 %v1624_v36, %v1623_v19 }
 0x286   : > { %v1585_v41 = vrot.slane %v1584_v38, 1  ;;  %v1620_v42 = vadd.f32 %v1619_v14, %v1618_v33  ;;  %v1591_v26 = vadd.f32 %v1590_v39, %v1589_v35  ;;  %v1626_v34 = vrot.slane %v1625_v40, 2 }
 0x288   : > { %v1586_v43 = vadd.f32 %v1585_v41, %v1584_v38  ;;  %v1621_v44 = vrot.slane %v1620_v42, 1  ;;  %v1592_v45 = vrot.slane %v1591_v26, 1  ;;  %v1627_v46 = vadd.f32 %v1626_v34, %v1625_v40 }
 0x28a   : > { %v1622_v47 = vadd.f32 %v1621_v44, %v1620_v42  ;;  %v1644_v15 = vmul.f32 0.0625, %v1586_v43  ;;  %v1593_v48 = vadd.f32 %v1592_v45, %v1591_v26  ;;  %v1628_v49 = vrot.slane %v1627_v46, 1 }
 0x28c   : > { %v1648_v27 = vmul.f32 0.0625, %v1622_v47  ;;  %v1652_v37 = vmul.f32 %v1644_v15, %v1644_v15  ;;  %v1629_v50 = vadd.f32 %v1628_v49, %v1627_v46  ;;  %v1645_v51 = vmul.f32 0.0625, %v1593_v48 }
 0x28d   : > { %v1697_v9 = vsub.f32 %v3443_v10, %v1644_v15  ;;  %v1701_v16 = vsub.f32 %v3447_v22, %v1644_v15 }
 0x28e   : > { %v1656_v52 = vsub.f32 %v1648_v27, %v1652_v37  ;;  %v1649_v53 = vmul.f32 0.0625, %v1629_v50  ;;  %v1653_v54 = vmul.f32 %v1645_v51, %v1645_v51  ;;  %v1698_v5 = vsub.f32 %v3445_v11, %v1645_v51 }
 0x28f   : > { %v1702_v12 = vsub.f32 %v3455_v28, %v1645_v51 }
 0x290   : > { %v1660_v55 = vmax.f32 %v1656_v52, 0.0  ;;  %v1657_v56 = vsub.f32 %v1649_v53, %v1653_v54 }
 0x292   : > { %v1664_v57 = vadd.f32 1e-05, %v1660_v55  ;;  %v1661_v59 = vmax.f32 %v1657_v56, 0.0 }
 0x294   : > { %2785 = vrsqrt.f32 %v1664_v57  ;;  %v1665_v60 = vadd.f32 1e-05, %v1661_v59 }
 0x296   : > { %2787 = vrsqrt.f32 %v1665_v60 }
 0x2a1   : > { %v2786_v2 = vpop.eup %2785 }
 0x2a2   : > { %v1693_v7 = vmul.f32 %v2786_v2, %v1676_v1 }
 0x2a3   : > { %v2788_v8 = vpop.eup %2787 }
 0x2a4   : > { %v1708_v20 = vrot.slane %v1693_v7, %v3468_v62  ;;  %v1694_v24 = vmul.f32 %v2788_v8, %v1680_v6 }
 0x2a6   : > { %v1721_v25 = vmul.f32 %v1708_v20, %v1697_v9  ;;  %v1725_v4 = vmul.f32 %v1708_v20, %v1701_v16  ;;  %v1712_v29 = vrot.slane %v1694_v24, %v3468_v62 }
 0x2a8   : > { %v1750_v17 = vadd.f32 %v1733_v23, %v1721_v25  ;;  %v1754_v10 = vadd.f32 %v1733_v23, %v1725_v4  ;;  %v1722_v30 = vmul.f32 %v1712_v29, %v1698_v5  ;;  %v1726_v22 = vmul.f32 %v1712_v29, %v1702_v12 }
 0x2aa   : > { %v1758_v31 = vmul.f32 0.2, %v1750_v17  ;;  %v1762_v13 = vmul.f32 0.2, %v1754_v10  ;;  %v1751_v32 = vadd.f32 %v1737_v18, %v1722_v30  ;;  %v1755_v19 = vadd.f32 %v1737_v18, %v1726_v22 }
 0x2ac   : > { %v1766_v21 = vmax.f32 %v1750_v17, %v1758_v31  ;;  %v1770_v33 = vmax.f32 %v1754_v10, %v1762_v13  ;;  %v1759_v35 = vmul.f32 0.2, %v1751_v32  ;;  %v1763_v36 = vmul.f32 0.2, %v1755_v19 }
 0x2ae   : > { %1774 = vst [vmem:[#allocation2 + $0x30] sm:$0xff] %v1766_v21  ;;  %1778 = vst [vmem:[#allocation2 + $0x8] sm:$0xff] %v1770_v33  ;;  %v1767_v11 = vmax.f32 %v1751_v32, %v1759_v35  ;;  %v1771_v28 = vmax.f32 %v1755_v19, %v1763_v36  ;;  %v1683_v35 = vsub.s32 2, %v3465_v61  ;;  %v1687_v36 = vsub.s32 3, %v3465_v61 }
 0x2b0   : > { %1775 = vst [vmem:[#allocation2] sm:$0xff] %v1767_v11  ;;  %1779 = vst [vmem:[#allocation2 + $0x20] sm:$0xff] %v1771_v28  ;;  %v1684_v11 = vrot.slane %v3470_v63, %v1683_v35 }
 0x2b4   : > { %v1528_v38 = vpop.f32.mrf.mxu0 }
 0x2b5   : > { %v1571_v14 = vpop.f32.mrf.mxu1 }
 0x2b6   : > { %v1530_v39 = vpop.f32.mrf.mxu0  ;;  %v3487_v41 = vadd.f32 %v1571_v14, %v1528_v38  ;;  %v1688_v38 = vrot.slane %v3470_v63, %v1687_v36  ;;  %v1745_v63 = vrot.slane %v3475_v3, %v1687_v36 }
 0x2b7   : > { %v1573_v40 = vpop.f32.mrf.mxu1 }
 0x2b8   : > { %v3489_v42 = vadd.f32 %v1573_v40, %v1530_v39  ;;  %v1532_v26 = vpop.f32.mrf.mxu0  ;;  %v1610_v46 = vmul.f32 %v3487_v41, %v3487_v41 }
 0x2b9   : > { %v1575_v34 = vpop.f32.mrf.mxu1 }
 0x2ba   : > { %v3491_v43 = vadd.f32 %v1575_v34, %v1532_v26  ;;  %v1534_v44 = vpop.f32.mrf.mxu0  ;;  %v1611_v49 = vmul.f32 %v3489_v42, %v3489_v42 }
 0x2bb   : > { %v1577_v45 = vpop.f32.mrf.mxu1 }
 0x2bc   : > { %v1594_v47 = vadd.f32 %v3491_v43, %v3487_v41  ;;  %v1614_v15 = vmul.f32 %v3491_v43, %v3491_v43  ;;  %v3499_v48 = vadd.f32 %v1577_v45, %v1534_v44  ;;  %v1741_v44 = vrot.slane %v3475_v3, %v1683_v35 }
 0x2be   : > { %v1595_v27 = vrot.slane %v1594_v47, 4  ;;  %v1630_v37 = vadd.f32 %v1614_v15, %v1610_v46  ;;  %v1601_v50 = vadd.f32 %v3499_v48, %v3489_v42  ;;  %v1615_v51 = vmul.f32 %v3499_v48, %v3499_v48 }
 0x2c0   : > { %v1596_v52 = vadd.f32 %v1595_v27, %v1594_v47  ;;  %v1631_v53 = vrot.slane %v1630_v37, 4  ;;  %v1602_v54 = vrot.slane %v1601_v50, 4  ;;  %v1637_v55 = vadd.f32 %v1615_v51, %v1611_v49 }
 0x2c2   : > { %v1597_v56 = vrot.slane %v1596_v52, 2  ;;  %v1632_v57 = vadd.f32 %v1631_v53, %v1630_v37  ;;  %v1603_v58 = vadd.f32 %v1602_v54, %v1601_v50  ;;  %v1638_v59 = vrot.slane %v1637_v55, 4 }
 0x2c4   : > { %v1598_v60 = vadd.f32 %v1597_v56, %v1596_v52  ;;  %v1633_v0 = vrot.slane %v1632_v57, 2  ;;  %v1604_v1 = vrot.slane %v1603_v58, 2  ;;  %v1639_v2 = vadd.f32 %v1638_v59, %v1637_v55 }
 0x2c6   : > { %v1599_v6 = vrot.slane %v1598_v60, 1  ;;  %v1634_v7 = vadd.f32 %v1633_v0, %v1632_v57  ;;  %v1605_v8 = vadd.f32 %v1604_v1, %v1603_v58  ;;  %v1640_v9 = vrot.slane %v1639_v2, 2 }
 0x2c8   : > { %v1600_v16 = vadd.f32 %v1599_v6, %v1598_v60  ;;  %v1635_v20 = vrot.slane %v1634_v7, 1  ;;  %v1606_v23 = vrot.slane %v1605_v8, 1  ;;  %v1641_v24 = vadd.f32 %v1640_v9, %v1639_v2 }
 0x2ca   : > { %v1636_v25 = vadd.f32 %v1635_v20, %v1634_v7  ;;  %v1646_v4 = vmul.f32 0.0625, %v1600_v16  ;;  %v1607_v5 = vadd.f32 %v1606_v23, %v1605_v8  ;;  %v1642_v12 = vrot.slane %v1641_v24, 1 }
 0x2cc   : > { %v1650_v29 = vmul.f32 0.0625, %v1636_v25  ;;  %v1654_v18 = vmul.f32 %v1646_v4, %v1646_v4  ;;  %v1643_v17 = vadd.f32 %v1642_v12, %v1641_v24  ;;  %v1647_v10 = vmul.f32 0.0625, %v1607_v5 }
 0x2cd   : > { %v1699_v40 = vsub.f32 %v3487_v41, %v1646_v4  ;;  %v1703_v26 = vsub.f32 %v3491_v43, %v1646_v4 }
 0x2ce   : > { %v1658_v30 = vsub.f32 %v1650_v29, %v1654_v18  ;;  %v1651_v22 = vmul.f32 0.0625, %v1643_v17  ;;  %v1655_v31 = vmul.f32 %v1647_v10, %v1647_v10  ;;  %v1700_v61 = vsub.f32 %v3489_v42, %v1647_v10 }
 0x2cf   : > { %v1704_v15 = vsub.f32 %v3499_v48, %v1647_v10 }
 0x2d0   : > { %v1662_v13 = vmax.f32 %v1658_v30, 0.0  ;;  %v1659_v32 = vsub.f32 %v1651_v22, %v1655_v31 }
 0x2d2   : > { %v1666_v19 = vadd.f32 1e-05, %v1662_v13  ;;  %v1663_v21 = vmax.f32 %v1659_v32, 0.0 }
 0x2d4   : > { %2789 = vrsqrt.f32 %v1666_v19  ;;  %v1667_v33 = vadd.f32 1e-05, %v1663_v21 }
 0x2d6   : > { %2791 = vrsqrt.f32 %v1667_v33 }
 0x2e1   : > { %v2790_v28 = vpop.eup %2789 }
 0x2e2   : > { %v1695_v14 = vmul.f32 %v2790_v28, %v1684_v11 }
 0x2e3   : > { %v2792_v39 = vpop.eup %2791 }
 0x2e4   : > { %v1716_v34 = vrot.slane %v1695_v14, %v3468_v62  ;;  %v1696_v45 = vmul.f32 %v2792_v39, %v1688_v38 }
 0x2e6   : > { %v1723_v46 = vmul.f32 %v1716_v34, %v1699_v40  ;;  %v1727_v47 = vmul.f32 %v1716_v34, %v1703_v26  ;;  %v1720_v49 = vrot.slane %v1696_v45, %v3468_v62 }
 0x2e8   : > { %v1752_v27 = vadd.f32 %v1741_v44, %v1723_v46  ;;  %v1756_v37 = vadd.f32 %v1741_v44, %v1727_v47  ;;  %v1724_v41 = vmul.f32 %v1720_v49, %v1700_v61  ;;  %v1728_v50 = vmul.f32 %v1720_v49, %v1704_v15 }
 0x2ea   : > { %v1760_v43 = vmul.f32 0.2, %v1752_v27  ;;  %v1764_v51 = vmul.f32 0.2, %v1756_v37  ;;  %v1753_v52 = vadd.f32 %v1745_v63, %v1724_v41  ;;  %v1757_v53 = vadd.f32 %v1745_v63, %v1728_v50 }
 0x2ec   : > { %v1768_v54 = vmax.f32 %v1752_v27, %v1760_v43  ;;  %v1772_v55 = vmax.f32 %v1756_v37, %v1764_v51  ;;  %v1761_v56 = vmul.f32 0.2, %v1753_v52  ;;  %v1765_v57 = vmul.f32 0.2, %v1757_v53  ;;  %1785 = sbr.rel (%p2401_p12) target bundleno = 1008 (0x3f0), region = 64 }
 0x2ee   : > { %1776 = vst [vmem:[#allocation2 + $0x18] sm:$0xff] %v1768_v54  ;;  %1780 = vst [vmem:[#allocation2 + $0x28] sm:$0xff] %v1772_v55  ;;  %v1769_v42 = vmax.f32 %v1753_v52, %v1761_v56  ;;  %v1773_v48 = vmax.f32 %v1757_v53, %v1765_v57 }
 0x2f0   : > { %1777 = vst [vmem:[#allocation2 + $0x10] sm:$0xff] %v1769_v42  ;;  %1781 = vst [vmem:[#allocation2 + $0x38] sm:$0xff] %v1773_v48 }
 0x2f1   : > { %3011 = dma.done.wait [#allocation4], 4096 }
 0x2f2   : > { %3012 = vsyncadd [#allocation4], 4294963200  ;;  %v2793_v62 = vld [vmem:[#allocation3 + $0x78] sm:$0xff]   ;;  %v2797_v60 = vld [vmem:[#allocation3 + $0x70] sm:$0xff]  }
 0x2f3   : > { %v2794_v3 = vld [vmem:[#allocation3 + $0xf8] sm:$0xff]   ;;  %2442 = vmatprep.subr.bf16.mxu0 %v2793_v62  ;;  %v2798_v0 = vld [vmem:[#allocation3 + $0xf0] sm:$0xff]   ;;  %v2801_v6 = vld [vmem:[#allocation3 + $0x68] sm:$0xff]  }
 0x2f4   : > { %v2795_v58 = vld [vmem:[#allocation3 + $0x38] sm:$0xff]   ;;  %2464 = vmatprep.subr.bf16.mxu1 %v2794_v3  ;;  %v2799_v1 = vld [vmem:[#allocation3 + $0x30] sm:$0xff]   ;;  %v2802_v7 = vld [vmem:[#allocation3 + $0xe8] sm:$0xff]  }
 0x2f5   : > { %v2796_v59 = vld [vmem:[#allocation3 + $0xb8] sm:$0xff]   ;;  %2443 = vmatpush3.bf16.msra.mxu0 %v2795_v58  ;;  %v2800_v2 = vld [vmem:[#allocation3 + $0xb0] sm:$0xff]   ;;  %v2803_v8 = vld [vmem:[#allocation3 + $0x28] sm:$0xff]  }
 0x2f6   : > { %2465 = vmatpush3.bf16.msra.mxu1 %v2796_v59  ;;  %2444 = vmatprep.subr.bf16.mxu0 %v2797_v60  ;;  %v2804_v9 = vld [vmem:[#allocation3 + $0xa8] sm:$0xff]   ;;  %v2805_v16 = vld [vmem:[#allocation3 + $0x60] sm:$0xff]   ;;  %v2809_v25 = vld [vmem:[#allocation3 + $0x58] sm:$0xff]  }
 0x2f7   : > { %2466 = vmatprep.subr.bf16.mxu1 %v2798_v0  ;;  %v2806_v20 = vld [vmem:[#allocation3 + $0xe0] sm:$0xff]   ;;  %v2810_v4 = vld [vmem:[#allocation3 + $0xd8] sm:$0xff]   ;;  %v2813_v29 = vld [vmem:[#allocation3 + $0x50] sm:$0xff]  }
 0x2f8   : > { %v2807_v23 = vld [vmem:[#allocation3 + $0x20] sm:$0xff]   ;;  %v2811_v5 = vld [vmem:[#allocation3 + $0x18] sm:$0xff]   ;;  %v2814_v18 = vld [vmem:[#allocation3 + $0xd0] sm:$0xff]  }
 0x2f9   : > { %2445 = vmatpush3.bf16.msra.mxu0 %v2799_v1  ;;  %v2808_v24 = vld [vmem:[#allocation3 + $0xa0] sm:$0xff]   ;;  %v2812_v12 = vld [vmem:[#allocation3 + $0x98] sm:$0xff]   ;;  %v2815_v17 = vld [vmem:[#allocation3 + $0x10] sm:$0xff]  }
 0x2fa   : > { %2467 = vmatpush3.bf16.msra.mxu1 %v2800_v2  ;;  %2446 = vmatprep.subr.bf16.mxu0 %v2801_v6  ;;  %v2816_v10 = vld [vmem:[#allocation3 + $0x90] sm:$0xff]   ;;  %v2817_v30 = vld [vmem:[#allocation3 + $0x48] sm:$0xff]   ;;  %v2821_v32 = vld [vmem:[#allocation3 + $0x40] sm:$0xff]  }
 0x2fb   : > { %2468 = vmatprep.subr.bf16.mxu1 %v2802_v7  ;;  %v2818_v22 = vld [vmem:[#allocation3 + $0xc8] sm:$0xff]   ;;  %v2822_v19 = vld [vmem:[#allocation3 + $0xc0] sm:$0xff]   ;;  %v1793_v11 = vld [vmem:[#allocation2 + $0x10] sm:$0xff] }
 0x2fc   : > { %v2819_v31 = vld [vmem:[#allocation3 + $0x8] sm:$0xff]   ;;  %v2823_v21 = vld [vmem:[#allocation3] sm:$0xff]   ;;  %v1797_v38 = vld [vmem:[#allocation2 + $0x38] sm:$0xff] }
 0x2fd   : > { %2447 = vmatpush3.bf16.msra.mxu0 %v2803_v8  ;;  %v2820_v13 = vld [vmem:[#allocation3 + $0x88] sm:$0xff]   ;;  %v2824_v33 = vld [vmem:[#allocation3 + $0x80] sm:$0xff]   ;;  %v1790_v14 = vld [vmem:[#allocation2 + $0x30] sm:$0xff]  ;;  %v1801_v40 = vpack.c.bf16 %v1797_v38, %v1793_v11 }
 0x2fe   : > { %2469 = vmatpush3.bf16.msra.mxu1 %v2804_v9  ;;  %2448 = vmatprep.subr.bf16.mxu0 %v2805_v16  ;;  %v1791_v35 = vld [vmem:[#allocation2] sm:$0xff]  ;;  %v1794_v39 = vld [vmem:[#allocation2 + $0x8] sm:$0xff]  ;;  %v1792_v34 = vld [vmem:[#allocation2 + $0x18] sm:$0xff] }
 0x2ff   : > { %2470 = vmatprep.subr.bf16.mxu1 %v2806_v20  ;;  %v1795_v36 = vld [vmem:[#allocation2 + $0x20] sm:$0xff]  ;;  %v1798_v26 = vpack.c.bf16 %v1794_v39, %v1790_v14  ;;  %v1796_v44 = vld [vmem:[#allocation2 + $0x28] sm:$0xff]  ;;  %2132 = vmatprep.mubr.bf16.mxu1 %v1801_v40  ;;  %v1866_v61 = vld [vmem:[#allocation11 + $0x20] ss:$0 sm:$0xff] }
 0x300   : > { %v1799_v28 = vpack.c.bf16 %v1795_v36, %v1791_v35  ;;  %v1800_v45 = vpack.c.bf16 %v1796_v44, %v1792_v34 }
 0x301   : > { %2449 = vmatpush3.bf16.msra.mxu0 %v2807_v23 }
 0x302   : > { %2471 = vmatpush3.bf16.msra.mxu1 %v2808_v24  ;;  %2450 = vmatprep.subr.bf16.mxu0 %v2809_v25 }
 0x303   : > { %2472 = vmatprep.subr.bf16.mxu1 %v2810_v4  ;;  %2091 = vmatprep.mubr.bf16.mxu0 %v1799_v28 }
 0x305   : > { %2451 = vmatpush3.bf16.msra.mxu0 %v2811_v5 }
 0x306   : > { %2473 = vmatpush3.bf16.msra.mxu1 %v2812_v12  ;;  %2452 = vmatprep.subr.bf16.mxu0 %v2813_v29 }
 0x307   : > { %2474 = vmatprep.subr.bf16.mxu1 %v2814_v18 }
 0x309   : > { %2453 = vmatpush3.bf16.msra.mxu0 %v2815_v17 }
 0x30a   : > { %2475 = vmatpush3.bf16.msra.mxu1 %v2816_v10  ;;  %2454 = vmatprep.subr.bf16.mxu0 %v2817_v30 }
 0x30b   : > { %2476 = vmatprep.subr.bf16.mxu1 %v2818_v22 }
 0x30d   : > { %2455 = vmatpush3.bf16.msra.mxu0 %v2819_v31 }
 0x30e   : > { %2477 = vmatpush3.bf16.msra.mxu1 %v2820_v13  ;;  %2456 = vmatprep.subr.bf16.mxu0 %v2821_v32 }
 0x30f   : > { %2478 = vmatprep.subr.bf16.mxu1 %v2822_v19 }
 0x311   : > { %2457 = vmatpush3.bf16.msra.mxu0 %v2823_v21 }
 0x312   : > { %2479 = vmatpush3.bf16.msra.mxu1 %v2824_v33 }
 0x314   : > { %2092 = vmatmul.mubr.bf16.vlgmr.msra.gmra.mxu0 %v1798_v26 }
 0x315   : > { %2133 = vmatmul.mubr.bf16.vlgmr.msra.gmra.mxu1 %v1800_v45 }
 0x3d4   : > { %v2458_v46 = vpop.f32.mrf.mxu0 }
 0x3d5   : > { %v2480_v47 = vpop.f32.mrf.mxu1 }
 0x3d6   : > { %v2459_v15 = vpop.f32.mrf.mxu0 }
 0x3d7   : > { %v2460_v49 = vadd.f32 %v2459_v15, %v2458_v46  ;;  %v2481_v63 = vpop.f32.mrf.mxu1 }
 0x3d8   : > { %v2461_v27 = vpop.f32.mrf.mxu0  ;;  %v2482_v41 = vadd.f32 %v2481_v63, %v2480_v47 }
 0x3d9   : > { %v2094_v37 = vadd.f32 %v2460_v49, %v1866_v61  ;;  %v2483_v50 = vpop.f32.mrf.mxu1 }
 0x3da   : > { %v2462_v43 = vpop.f32.mrf.mxu0 }
 0x3db   : > { %v2135_v51 = vadd.f32 %v2482_v41, %v2094_v37  ;;  %v2463_v52 = vadd.f32 %v2462_v43, %v2461_v27  ;;  %v2484_v53 = vpop.f32.mrf.mxu1 }
 0x3dc   : > { %v2485_v55 = vadd.f32 %v2484_v53, %v2483_v50 }
 0x3dd   : > { %2825 = vtanh.f32 %v2135_v51  ;;  %v2097_v54 = vadd.f32 %v2463_v52, %v1866_v61 }
 0x3df   : > { %v2138_v56 = vadd.f32 %v2485_v55, %v2097_v54 }
 0x3e1   : > { %2827 = vtanh.f32 %v2138_v56 }
 0x3ea   : > { %v2826_v57 = vpop.eup %2825 }
 0x3eb   : > { %2143 = vst [vmem:[#allocation12] sm:$0xff] %v2826_v57 }
 0x3ee   : > { %v2828_v42 = vpop.eup %2827 }
 0x3ef   : > { %2144 = vst [vmem:[#allocation12 + $0x8] sm:$0xff] %v2828_v42 }
 0x3f0 PF: > { %p2525_p6 = scmp.eq.s32.totalorder %s3097_s22, 2  ;;  %s3045_s24 = smov [#allocation12]  }
 0x3f1   : > { %s2151_s29 = sshll.u32 %s3045_s24, 4  ;;  %s2152_s29 = int_to_ptr.vmem [resolvable:$true] %s2151_s29 }
 0x3f2   : > { %s2955_s25 = scalar_lea.vmem %s2152_s29, 256  ;;  %p2962_p0 = scmp.lt.s32.totalorder %s2152_s29, %s2152_s29 }
 0x3f3   : > { %p2956_p7 = scmp.ne.s32.totalorder %s2152_s29, %s2955_s25  ;;  %p2963_p11 = scmp.lt.s32.totalorder %s2955_s25, %s2955_s25 }
 0x3f5   : > { %p2957_p8 = pnand %p2956_p7, %p2525_p6  ;;  %p2964_p4 = por %p2963_p11, %p2962_p0 }
 0x3f7   : > { %p2958_p10 = pneg %p2957_p8 }
 0x3f9   : > { %p2965_p13 = pnand %p2964_p4, %p2958_p10 }
 0x3fb   : > { %2968 = shalt.err (!%p2965_p13)
}
 0x3fc   : > { %s3046_s28 = smov 128   ;;  %s3047_s27 = smov 8  }
 0x3fd   : > { %2501 = dma.vmem_to_hbm [thread:$0]  (%p2525_p6), %s2152_s29, 256, %s3550_s5, [#allocation7], %s3046_s28, %s3046_s28, %s3047_s27  }
 0x3fe   : > { %3014 = dma.done.wait (%p2525_p6), [#allocation7], 256  }
 0x3ff   : > { %3016 = vsyncadd (%p2525_p6), [#allocation7], 4294967040 }
 0x400 PF: > { %p15_p2 = scmp.ge.s32.totalorder %s3100_s23, 5   ;;  %s3572_s18 = smov %s3023_s19 }
 0x401   : > { %s3573_s19 = smov %s3027_s20  ;;  %s3574_s20 = smov %s3110_s26 }
 0x402   : > { %s3575_s21 = smov %s3100_s23  ;;  %17 = sbr.rel (!%p15_p2) target bundleno = 4 (0x4), region = 99 }
 0x407   :  { %2167 = vsyncpa [#allocation6], 1 }
 0x408   :  { %2169 = vsyncpa [#allocation6 + $0x1], 1 }
 0x409   :  { %2170 = vsyncpa [#allocation9], 1 }
 0x40a   :  { %2171 = vsyncpa [#allocation7], 1 }
 0x40b   :  { %2173 = vsyncpa [#allocation7 + $0x1], 1 }
 0x40c   :  { %2174 = vsyncmov [#allocation4] }
 0x40f   :  { %s2175_s22 = vpop.sfrf %2174 }
 0x410   :  { %p2438_p9 = scmp.ne.s32.totalorder %s2175_s22, 0 }
 0x412   :  { %2179 = shalt.err (%p2438_p9)  }

</bundles_post_ra>
